<compile_context>
chip_gen: v7x
topology: tpu7x:2x2x1
jax: 0.10.0
libtpu: 0.0.40
codegen_flags: <defaults>
</compile_context>

<pallas_src>
import functools

import jax
import jax.numpy as jnp
from jax.experimental import pallas as pl
from jax.experimental.pallas import tpu as pltpu


LANE = 128       # f32 lane width (padded hidden / action width)
SUBLANE = 8      # f32 sublane height
NEG_BIG = -1e30  # finite mask value for padded logits (exp underflows to 0)


def _round_up(n, m):
    return ((n + m - 1) // m) * m


# ---------------------------------------------------------------------------
# Fused kernel: all linear layers + final softmax in one body.
#   x_ref : (tb, obs_p)        input rows (obs_p = obs rounded to sublane)
#   w0_ref: (obs_p, 128)       first layer weight (zero-padded)
#   ws_ref: (L-1, 128, 128)    stacked weights for layers 1..L-1
#   bs_ref: (L, 1, 128)        stacked biases; final bias holds NEG_BIG mask
# ---------------------------------------------------------------------------
def _make_fused_mlp_kernel(num_layers):
    def kernel(x_ref, w0_ref, ws_ref, bs_ref, o_ref):
        # First layer (obs -> hidden), ReLU.
        h = jnp.maximum(
            jnp.dot(x_ref[...], w0_ref[...],
                    preferred_element_type=jnp.float32) + bs_ref[0], 0.0)

        # Middle hidden layers (hidden -> hidden), ReLU.  Statically unrolled;
        # weight loads stay inside the loop body.
        for li in range(1, num_layers - 1):
            h = jnp.maximum(
                jnp.dot(h, ws_ref[li - 1],
                        preferred_element_type=jnp.float32) + bs_ref[li], 0.0)

        # Final layer (hidden -> actions) + numerically stable softmax.
        # Padded action lanes get logit NEG_BIG via the baked-in bias, so they
        # carry exactly zero probability mass.
        y = jnp.dot(h, ws_ref[num_layers - 2],
                    preferred_element_type=jnp.float32) + bs_ref[num_layers - 1]
        y = y - jnp.max(y, axis=-1, keepdims=True)
        e = jnp.exp(y)
        o_ref[...] = (e / jnp.sum(e, axis=-1, keepdims=True)).astype(o_ref.dtype)

    return kernel


# ---------------------------------------------------------------------------
# Parameter setup (mimics nn.Linear's U(-1/sqrt(fan_in), 1/sqrt(fan_in))).
# Hidden/action dims are zero-padded to the 128-lane width; the final bias
# carries NEG_BIG in the padded action lanes (softmax mask baked in).
# ---------------------------------------------------------------------------
def init_mlp_params(key, obs, actions, layers, l_size):
    assert l_size <= LANE and actions <= LANE, "widths must fit one 128-lane tile"
    dims = [(obs, l_size)] + [(l_size, l_size)] * layers + [(l_size, actions)]
    L = len(dims)

    raw = []  # unpadded (w, b) pairs for the pure-JAX reference
    for fan_in, fan_out in dims:
        key, kw, kb = jax.random.split(key, 3)
        bound = 1.0 / jnp.sqrt(float(fan_in))
        w = jax.random.uniform(kw, (fan_in, fan_out), jnp.float32, -bound, bound)
        b = jax.random.uniform(kb, (fan_out,), jnp.float32, -bound, bound)
        raw.append((w, b))

    obs_p = _round_up(obs, SUBLANE)
    w0 = jnp.zeros((obs_p, LANE), jnp.float32).at[:obs, :l_size].set(raw[0][0])

    w_stack = jnp.zeros((L - 1, LANE, LANE), jnp.float32)
    b_stack = jnp.zeros((L, 1, LANE), jnp.float32)
    b_stack = b_stack.at[0, 0, :l_size].set(raw[0][1])
    for li in range(1, L):
        fan_in, fan_out = dims[li]
        w_stack = w_stack.at[li - 1, :fan_in, :fan_out].set(raw[li][0])
        b_stack = b_stack.at[li, 0, :fan_out].set(raw[li][1])
    # Bake the padded-logit softmax mask into the final layer's bias.
    b_stack = b_stack.at[L - 1, 0, actions:].set(NEG_BIG)

    return (w0, w_stack, b_stack), raw


# ---------------------------------------------------------------------------
# Forward pass (matches mlp.forward: ReLU on all but last, softmax on last)
# ---------------------------------------------------------------------------
@functools.partial(jax.jit, static_argnames=("actions", "block_rows"))
def mlp_forward(x, w0, w_stack, b_stack, *, actions, block_rows=512):
    x = x.astype(jnp.float32)
    batch, obs = x.shape
    obs_p = w0.shape[0]
    out_pad = w_stack.shape[-1]
    num_layers = b_stack.shape[0]

    # Batch tile: multiple of 8 sublanes; single grid step for small batches.
    tb = min(block_rows, _round_up(batch, SUBLANE))
    batch_pad = _round_up(batch, tb)

    if batch_pad == batch and obs_p == obs:
        xp = x                                   # no wrapper-side copy
    else:
        xp = jnp.zeros((batch_pad, obs_p), jnp.float32).at[:batch, :obs].set(x)

    grid = (batch_pad // tb,)

    probs_pad = pl.pallas_call(
        _make_fused_mlp_kernel(num_layers),
        out_shape=jax.ShapeDtypeStruct((batch_pad, out_pad), jnp.float32),
        grid=grid,
        in_specs=[
            pl.BlockSpec((tb, obs_p), lambda i: (i, 0)),
            pl.BlockSpec(w0.shape, lambda i: (0, 0)),
            pl.BlockSpec(w_stack.shape, lambda i: (0, 0, 0)),
            pl.BlockSpec(b_stack.shape, lambda i: (0, 0, 0)),
        ],
        out_specs=pl.BlockSpec((tb, out_pad), lambda i: (i, 0)),
        compiler_params=pltpu.CompilerParams(
            dimension_semantics=("parallel",)),
    )(xp, w0, w_stack, b_stack)

    return probs_pad[:batch, :actions]


# ---------------------------------------------------------------------------
# Pure-JAX reference (uses the unpadded weights)
# ---------------------------------------------------------------------------
def ref_forward(x, raw):
    h = x
    for i, (w, b) in enumerate(raw):
        y = h @ w + b
        h = jnp.maximum(y, 0.0) if i < len(raw) - 1 else jax.nn.softmax(y, -1)
    return h


# ---------------------------------------------------------------------------
if __name__ == "__main__":
    # Shapes consistent with the module: obs=16, l_size=32, 2 hidden layers,
    # actions=4.  Batch of 256 rows -> single 256-row block (grid of 1).
    obs, actions, layers, l_size = 16, 4, 2, 32
    batch = 256

    key = jax.random.PRNGKey(0)
    key, kx = jax.random.split(key)
    x = jax.random.normal(kx, (batch, obs), jnp.float32)

    (w0, w_stack, b_stack), raw = init_mlp_params(key, obs, actions, layers, l_size)

    probs = mlp_forward(x, w0, w_stack, b_stack, actions=actions)
    jax.block_until_ready(probs)

    # Sanity: correct shape, rows sum to 1, matches pure-JAX reference.
    assert probs.shape == (batch, actions)
    assert bool(jnp.allclose(jnp.sum(probs, axis=-1), 1.0, atol=1e-4))
    expected = ref_forward(x, raw)
    assert bool(jnp.allclose(probs, expected, atol=1e-3, rtol=1e-3))

    # TODO(synk): mlp.act's Categorical sampling / log_prob is host-side RL
    # logic (torch.distributions), not part of the forward pass — not ported.
    print("KERNEL_OK")
</pallas_src>

<mosaic_0001>
module attributes {stable_mosaic.version = 11 : i64} {
  func.func @kernel(%arg0: i32, %arg1: memref<256x16xf32, #tpu.memory_space<vmem>>, %arg2: memref<16x128xf32, #tpu.memory_space<vmem>>, %arg3: memref<3x128x128xf32, #tpu.memory_space<vmem>>, %arg4: memref<4x1x128xf32, #tpu.memory_space<vmem>>, %arg5: memref<256x128xf32, #tpu.memory_space<vmem>>) attributes {dimension_semantics = [#tpu.dimension_semantics<parallel>], iteration_bounds = array<i64: 1>, scalar_prefetch = 0 : i64, scratch_operands = 0 : i64, tpu.core_type = #tpu.core_type<tc>, window_params = [{transform_indices = @transform_0, window_bounds = array<i64: 256, 16>}, {pipeline_mode = #tpu.pipeline_mode<synchronous>, transform_indices = @transform_1, window_bounds = array<i64: 16, 128>}, {pipeline_mode = #tpu.pipeline_mode<synchronous>, transform_indices = @transform_2, window_bounds = array<i64: 3, 128, 128>}, {pipeline_mode = #tpu.pipeline_mode<synchronous>, transform_indices = @transform_3, window_bounds = array<i64: 4, 1, 128>}, {transform_indices = @transform_4, window_bounds = array<i64: 256, 128>}]} {
    %c0 = arith.constant 0 : index
    %c0_0 = arith.constant 0 : index
    %0 = vector.load %arg1[%c0, %c0_0] : memref<256x16xf32, #tpu.memory_space<vmem>>, vector<256x16xf32>
    %c0_1 = arith.constant 0 : index
    %c0_2 = arith.constant 0 : index
    %1 = vector.load %arg2[%c0_1, %c0_2] : memref<16x128xf32, #tpu.memory_space<vmem>>, vector<16x128xf32>
    %cst = arith.constant dense<0.000000e+00> : vector<256x128xf32>
    %2 = tpu.matmul %0, %1, %cst {dimension_numbers = #tpu.dot_dimension_numbers<[1], [0], [0], [1], [0, 0, 1, 1], [], []>} : vector<256x16xf32>, vector<16x128xf32>, vector<256x128xf32> -> vector<256x128xf32>
    %c0_3 = arith.constant 0 : index
    %c0_4 = arith.constant 0 : index
    %c0_5 = arith.constant 0 : index
    %3 = vector.load %arg4[%c0_3, %c0_4, %c0_5] : memref<4x1x128xf32, #tpu.memory_space<vmem>>, vector<1x1x128xf32>
    %4 = vector.shape_cast %3 : vector<1x1x128xf32> to vector<1x128xf32>
    %5 = vector.broadcast %4 : vector<1x128xf32> to vector<256x128xf32>
    %6 = arith.addf %2, %5 : vector<256x128xf32>
    %cst_6 = arith.constant 0.000000e+00 : f32
    %7 = vector.broadcast %cst_6 : f32 to vector<256x128xf32>
    %8 = arith.maximumf %6, %7 : vector<256x128xf32>
    %c0_7 = arith.constant 0 : index
    %c0_8 = arith.constant 0 : index
    %c0_9 = arith.constant 0 : index
    %9 = vector.load %arg3[%c0_7, %c0_8, %c0_9] : memref<3x128x128xf32, #tpu.memory_space<vmem>>, vector<1x128x128xf32>
    %10 = vector.shape_cast %9 : vector<1x128x128xf32> to vector<128x128xf32>
    %cst_10 = arith.constant dense<0.000000e+00> : vector<256x128xf32>
    %11 = tpu.matmul %8, %10, %cst_10 {dimension_numbers = #tpu.dot_dimension_numbers<[1], [0], [0], [1], [0, 0, 1, 1], [], []>} : vector<256x128xf32>, vector<128x128xf32>, vector<256x128xf32> -> vector<256x128xf32>
    %c1 = arith.constant 1 : index
    %c0_11 = arith.constant 0 : index
    %c0_12 = arith.constant 0 : index
    %12 = vector.load %arg4[%c1, %c0_11, %c0_12] : memref<4x1x128xf32, #tpu.memory_space<vmem>>, vector<1x1x128xf32>
    %13 = vector.shape_cast %12 : vector<1x1x128xf32> to vector<1x128xf32>
    %14 = vector.broadcast %13 : vector<1x128xf32> to vector<256x128xf32>
    %15 = arith.addf %11, %14 : vector<256x128xf32>
    %cst_13 = arith.constant 0.000000e+00 : f32
    %16 = vector.broadcast %cst_13 : f32 to vector<256x128xf32>
    %17 = arith.maximumf %15, %16 : vector<256x128xf32>
    %c1_14 = arith.constant 1 : index
    %c0_15 = arith.constant 0 : index
    %c0_16 = arith.constant 0 : index
    %18 = vector.load %arg3[%c1_14, %c0_15, %c0_16] : memref<3x128x128xf32, #tpu.memory_space<vmem>>, vector<1x128x128xf32>
    %19 = vector.shape_cast %18 : vector<1x128x128xf32> to vector<128x128xf32>
    %cst_17 = arith.constant dense<0.000000e+00> : vector<256x128xf32>
    %20 = tpu.matmul %17, %19, %cst_17 {dimension_numbers = #tpu.dot_dimension_numbers<[1], [0], [0], [1], [0, 0, 1, 1], [], []>} : vector<256x128xf32>, vector<128x128xf32>, vector<256x128xf32> -> vector<256x128xf32>
    %c2 = arith.constant 2 : index
    %c0_18 = arith.constant 0 : index
    %c0_19 = arith.constant 0 : index
    %21 = vector.load %arg4[%c2, %c0_18, %c0_19] : memref<4x1x128xf32, #tpu.memory_space<vmem>>, vector<1x1x128xf32>
    %22 = vector.shape_cast %21 : vector<1x1x128xf32> to vector<1x128xf32>
    %23 = vector.broadcast %22 : vector<1x128xf32> to vector<256x128xf32>
    %24 = arith.addf %20, %23 : vector<256x128xf32>
    %cst_20 = arith.constant 0.000000e+00 : f32
    %25 = vector.broadcast %cst_20 : f32 to vector<256x128xf32>
    %26 = arith.maximumf %24, %25 : vector<256x128xf32>
    %c2_21 = arith.constant 2 : index
    %c0_22 = arith.constant 0 : index
    %c0_23 = arith.constant 0 : index
    %27 = vector.load %arg3[%c2_21, %c0_22, %c0_23] : memref<3x128x128xf32, #tpu.memory_space<vmem>>, vector<1x128x128xf32>
    %28 = vector.shape_cast %27 : vector<1x128x128xf32> to vector<128x128xf32>
    %cst_24 = arith.constant dense<0.000000e+00> : vector<256x128xf32>
    %29 = tpu.matmul %26, %28, %cst_24 {dimension_numbers = #tpu.dot_dimension_numbers<[1], [0], [0], [1], [0, 0, 1, 1], [], []>} : vector<256x128xf32>, vector<128x128xf32>, vector<256x128xf32> -> vector<256x128xf32>
    %c3 = arith.constant 3 : index
    %c0_25 = arith.constant 0 : index
    %c0_26 = arith.constant 0 : index
    %30 = vector.load %arg4[%c3, %c0_25, %c0_26] : memref<4x1x128xf32, #tpu.memory_space<vmem>>, vector<1x1x128xf32>
    %31 = vector.shape_cast %30 : vector<1x1x128xf32> to vector<1x128xf32>
    %32 = vector.broadcast %31 : vector<1x128xf32> to vector<256x128xf32>
    %33 = arith.addf %29, %32 : vector<256x128xf32>
    %cst_27 = arith.constant dense<0xFF800000> : vector<256xf32>
    %34 = vector.multi_reduction <maximumf>, %33, %cst_27 [1] : vector<256x128xf32> to vector<256xf32>
    %35 = vector.shape_cast %34 : vector<256xf32> to vector<256x1xf32>
    %36 = vector.broadcast %35 : vector<256x1xf32> to vector<256x128xf32>
    %37 = arith.subf %33, %36 : vector<256x128xf32>
    %38 = math.exp %37 : vector<256x128xf32>
    %cst_28 = arith.constant dense<0.000000e+00> : vector<256xf32>
    %39 = vector.multi_reduction <add>, %38, %cst_28 [1] : vector<256x128xf32> to vector<256xf32>
    %40 = vector.shape_cast %39 : vector<256xf32> to vector<256x1xf32>
    %41 = vector.broadcast %40 : vector<256x1xf32> to vector<256x128xf32>
    %42 = arith.divf %38, %41 : vector<256x128xf32>
    %c0_29 = arith.constant 0 : index
    %c0_30 = arith.constant 0 : index
    %43 = vector.load %arg5[%c0_29, %c0_30] : memref<256x128xf32, #tpu.memory_space<vmem>>, vector<256x128xf32>
    tpu.vector_store %arg5[%c0_29, %c0_30], %42 {strides = array<i32>} : memref<256x128xf32, #tpu.memory_space<vmem>>, vector<256x128xf32>,
    return
  }
  func.func @transform_0(%arg0: i32) -> (i32, i32) {
    %c0_i32 = arith.constant 0 : i32
    %c0_i32_0 = arith.constant 0 : i32
    return %arg0, %c0_i32 : i32, i32
  }
  func.func @transform_1(%arg0: i32) -> (i32, i32) {
    %c0_i32 = arith.constant 0 : i32
    %c0_i32_0 = arith.constant 0 : i32
    %c0_i32_1 = arith.constant 0 : i32
    return %c0_i32, %c0_i32_0 : i32, i32
  }
  func.func @transform_2(%arg0: i32) -> (i32, i32, i32) {
    %c0_i32 = arith.constant 0 : i32
    %c0_i32_0 = arith.constant 0 : i32
    %c0_i32_1 = arith.constant 0 : i32
    %c0_i32_2 = arith.constant 0 : i32
    return %c0_i32, %c0_i32_0, %c0_i32_1 : i32, i32, i32
  }
  func.func @transform_3(%arg0: i32) -> (i32, i32, i32) {
    %c0_i32 = arith.constant 0 : i32
    %c0_i32_0 = arith.constant 0 : i32
    %c0_i32_1 = arith.constant 0 : i32
    %c0_i32_2 = arith.constant 0 : i32
    return %c0_i32, %c0_i32_0, %c0_i32_1 : i32, i32, i32
  }
  func.func @transform_4(%arg0: i32) -> (i32, i32) {
    %c0_i32 = arith.constant 0 : i32
    %c0_i32_0 = arith.constant 0 : i32
    return %arg0, %c0_i32 : i32, i32
  }
}

</mosaic_0001>

<bundles_post_ra>
// kernel: mlp_forward.1
= control target key start
LH: loop header
LB: loop body
LE: loop exit
PB: predicated region body
PF: predicated region fallthrough
CT: control target
= control target key end

     0   :  { %9 = vsyncpa [#allocation3], 0  ;;  %s2344_s15 = smov [#allocation2]   ;;  %s3054_s0 = inlined_call_operand.vmem [shape: f32[256,16], index: 0, kind: input, shape index: {}]   ;;  %s3055_s1 = inlined_call_operand.vmem [shape: f32[16,128], index: 1, kind: input, shape index: {}]   ;;  %s3056_s2 = inlined_call_operand.hbm [shape: f32[3,128,128], index: 2, kind: input, shape index: {}]   ;;  %s3057_s3 = inlined_call_operand.vmem [shape: f32[4,1,128], index: 3, kind: input, shape index: {}]   ;;  %s3058_s4 = inlined_call_operand.vmem [shape: f32[256,128], index: 4, kind: output, shape index: {}]  }
   0x1   :  { %s19_s16 = sshll.u32 %s2344_s15, 4  ;;  %s2320_s19 = scalar_lea.hbm %s3056_s2, 6144  ;;  %s20_s16 = int_to_ptr.vmem [resolvable:$true] %s19_s16 }
   0x2   :  { %p2321_p0 = scmp.ne.s32.totalorder %s3056_s2, %s2320_s19  ;;  %p2324_p1 = scmp.lt.u32.totalorder %s2320_s19, %s3056_s2 }
   0x4   :  { %p2326_p2 = pnand %p2324_p1, %p2321_p0 }
   0x6   :  { %2329 = shalt.err (!%p2326_p2)
}
   0x7   :  { %s2330_s24 = scalar_lea.vmem %s20_s16, 6144  ;;  %p2335_p4 = scmp.lt.s32.totalorder %s20_s16, %s20_s16 }
   0x8   :  { %p2331_p3 = scmp.ne.s32.totalorder %s20_s16, %s2330_s24  ;;  %p2336_p5 = scmp.lt.s32.totalorder %s2330_s24, %s2330_s24 }
   0xa   :  { %p2337_p6 = por %p2336_p5, %p2335_p4 }
   0xc   :  { %p2338_p7 = pnand %p2337_p6, %p2331_p3 }
   0xe   :  { %2341 = shalt.err (!%p2338_p7)
}
   0xf   :  { %s2345_s25 = smov 128   ;;  %s2346_s26 = smov 8  }
  0x10   :  { %25 = dma.hbm_to_vmem [thread:$0]  %s3056_s2, 6144, %s20_s16, [#allocation3], %s2345_s25, %s2345_s25, %s2346_s26  }
  0x11   :  { %2342 = dma.done.wait [#allocation3], 6144  }
  0x12   :  { %2343 = vsyncadd [#allocation3], 4294961152  ;;  %vm72_vm0 = vcmask 130048   ;;  %v63_v0 = vld [vmem:[%s3055_s1] sm:$0xff]  ;;  %v64_v1 = vld [vmem:[%s3055_s1 + $0x8] sm:$0xff] }
  0x13   :  { %v31_v2 = vld [vmem:[%s3054_s0] sm:$0xff]  ;;  %v2073_v3 = vpack.c.bf16 %v64_v1, %v63_v0  ;;  %v32_v4 = vld [vmem:[%s3054_s0 + $0x8] sm:$0xff]  ;;  %v33_v5 = vld [vmem:[%s3054_s0 + $0x10] sm:$0xff] }
  0x14   :  { %1785 = vmatprep.mubr.msk.f32.mxu0 %vm72_vm0, %v31_v2  ;;  %v34_v6 = vld [vmem:[%s3054_s0 + $0x18] sm:$0xff]  ;;  %v35_v7 = vld [vmem:[%s3054_s0 + $0x20] sm:$0xff]  ;;  %v427_v9 = vld [vmem:[#allocation2 + $0x8] sm:$0xff] }
  0x15   :  { %2074 = vmatprep.subr.bf16.mxu0 %v2073_v3  ;;  %v426_v8 = vld [vmem:[#allocation2] sm:$0xff]  ;;  %v36_v10 = vld [vmem:[%s3054_s0 + $0x28] sm:$0xff]  ;;  %v428_v12 = vld [vmem:[#allocation2 + $0x10] sm:$0xff] }
  0x16   :  { %2076 = vmatpush3.bf16.msra.mxu0 %v2073_v3  ;;  %v2077_v11 = vpack.c.bf16 %v427_v9, %v426_v8  ;;  %v429_v13 = vld [vmem:[#allocation2 + $0x18] sm:$0xff]  ;;  %v37_v14 = vld [vmem:[%s3054_s0 + $0x30] sm:$0xff]  ;;  %v430_v16 = vld [vmem:[#allocation2 + $0x20] sm:$0xff] }
  0x17   :  { %v2081_v15 = vpack.c.bf16 %v429_v13, %v428_v12  ;;  %v431_v17 = vld [vmem:[#allocation2 + $0x28] sm:$0xff]  ;;  %v38_v18 = vld [vmem:[%s3054_s0 + $0x38] sm:$0xff]  ;;  %v39_v20 = vld [vmem:[%s3054_s0 + $0x40] sm:$0xff] }
  0x18   :  { %2078 = vmatprep.subr.bf16.mxu1 %v2077_v11  ;;  %v2085_v19 = vpack.c.bf16 %v431_v17, %v430_v16  ;;  %v432_v21 = vld [vmem:[#allocation2 + $0x30] sm:$0xff]  ;;  %v433_v22 = vld [vmem:[#allocation2 + $0x38] sm:$0xff]  ;;  %v40_v23 = vld [vmem:[%s3054_s0 + $0x48] sm:$0xff] }
  0x19   :  { %1786 = vmatmul.mubr.msk.f32.vlgmr.msra.gmra.mrb[0].mxu0 %vm72_vm0, %v32_v4  ;;  %2080 = vmatpush3.bf16.msra.mxu1 %v2077_v11  ;;  %v2089_v24 = vpack.c.bf16 %v433_v22, %v432_v21  ;;  %v41_v25 = vld [vmem:[%s3054_s0 + $0x50] sm:$0xff]  ;;  %v434_v26 = vld [vmem:[#allocation2 + $0x40] sm:$0xff]  ;;  %v435_v27 = vld [vmem:[#allocation2 + $0x48] sm:$0xff] }
  0x1a   :  { %1788 = vmatprep.mubr.msk.f32.mxu0 %vm72_vm0, %v33_v5  ;;  %2082 = vmatprep.subr.bf16.mxu1 %v2081_v15  ;;  %v42_v28 = vld [vmem:[%s3054_s0 + $0x58] sm:$0xff]  ;;  %v2093_v29 = vpack.c.bf16 %v435_v27, %v434_v26  ;;  %v43_v30 = vld [vmem:[%s3054_s0 + $0x60] sm:$0xff]  ;;  %v436_v31 = vld [vmem:[#allocation2 + $0x50] sm:$0xff] }
  0x1b   :  { %v437_v32 = vld [vmem:[#allocation2 + $0x58] sm:$0xff]  ;;  %v44_v33 = vld [vmem:[%s3054_s0 + $0x68] sm:$0xff]  ;;  %v45_v35 = vld [vmem:[%s3054_s0 + $0x70] sm:$0xff] }
  0x1c   :  { %v2097_v34 = vpack.c.bf16 %v437_v32, %v436_v31  ;;  %v438_v36 = vld [vmem:[#allocation2 + $0x60] sm:$0xff]  ;;  %v439_v37 = vld [vmem:[#allocation2 + $0x68] sm:$0xff]  ;;  %v46_v38 = vld [vmem:[%s3054_s0 + $0x78] sm:$0xff] }
  0x1d   :  { %1789 = vmatmul.mubr.msk.f32.gmra.mrb[2].mxu0 %vm72_vm0, %v34_v6  ;;  %2084 = vmatpush3.bf16.msra.mxu1 %v2081_v15  ;;  %v2101_v39 = vpack.c.bf16 %v439_v37, %v438_v36  ;;  %v47_v40 = vld [vmem:[%s3054_s0 + $0x80] sm:$0xff]  ;;  %v48_v41 = vld [vmem:[%s3054_s0 + $0x88] sm:$0xff]  ;;  %v49_v42 = vld [vmem:[%s3054_s0 + $0x90] sm:$0xff] }
  0x1e   :  { %1791 = vmatprep.mubr.msk.f32.mxu0 %vm72_vm0, %v35_v7  ;;  %2086 = vmatprep.subr.bf16.mxu1 %v2085_v19  ;;  %v50_v43 = vld [vmem:[%s3054_s0 + $0x98] sm:$0xff]  ;;  %v51_v44 = vld [vmem:[%s3054_s0 + $0xa0] sm:$0xff]  ;;  %v52_v45 = vld [vmem:[%s3054_s0 + $0xa8] sm:$0xff] }
  0x1f   :  { %v53_v46 = vld [vmem:[%s3054_s0 + $0xb0] sm:$0xff]  ;;  %v54_v47 = vld [vmem:[%s3054_s0 + $0xb8] sm:$0xff]  ;;  %v55_v48 = vld [vmem:[%s3054_s0 + $0xc0] sm:$0xff] }
  0x20   :  { %v56_v49 = vld [vmem:[%s3054_s0 + $0xc8] sm:$0xff]  ;;  %v57_v50 = vld [vmem:[%s3054_s0 + $0xd0] sm:$0xff]  ;;  %v58_v51 = vld [vmem:[%s3054_s0 + $0xd8] sm:$0xff] }
  0x21   :  { %1792 = vmatmul.mubr.msk.f32.gmra.mrb[4].mxu0 %vm72_vm0, %v36_v10  ;;  %2088 = vmatpush3.bf16.msra.mxu1 %v2085_v19  ;;  %v59_v52 = vld [vmem:[%s3054_s0 + $0xe0] sm:$0xff]  ;;  %v60_v53 = vld [vmem:[%s3054_s0 + $0xe8] sm:$0xff]  ;;  %v61_v54 = vld [vmem:[%s3054_s0 + $0xf0] sm:$0xff] }
  0x22   :  { %1794 = vmatprep.mubr.msk.f32.mxu0 %vm72_vm0, %v37_v14  ;;  %2090 = vmatprep.subr.bf16.mxu1 %v2089_v24  ;;  %v62_v55 = vld [vmem:[%s3054_s0 + $0xf8] sm:$0xff]  ;;  %v440_v56 = vld [vmem:[#allocation2 + $0x70] sm:$0xff]  ;;  %v708_v59 = vld [vmem:[#allocation2 + $0x80] sm:$0xff] }
  0x23   :  { %v441_v57 = vld [vmem:[#allocation2 + $0x78] sm:$0xff]  ;;  %v709_v60 = vld [vmem:[#allocation2 + $0x88] sm:$0xff]  ;;  %v710_v61 = vld [vmem:[#allocation2 + $0x90] sm:$0xff] }
  0x24   :  { %v2105_v58 = vpack.c.bf16 %v441_v57, %v440_v56  ;;  %v2109_v62 = vpack.c.bf16 %v709_v60, %v708_v59  ;;  %v711_v63 = vld [vmem:[#allocation2 + $0x98] sm:$0xff]  ;;  %v712_v1 = vld [vmem:[#allocation2 + $0xa0] sm:$0xff]  ;;  %v713_v2 = vld [vmem:[#allocation2 + $0xa8] sm:$0xff] }
  0x25   :  { %1795 = vmatmul.mubr.msk.f32.gmra.mrb[6].mxu0 %vm72_vm0, %v38_v18  ;;  %2092 = vmatpush3.bf16.msra.mxu1 %v2089_v24  ;;  %v2113_v0 = vpack.c.bf16 %v711_v63, %v710_v61  ;;  %v2117_v3 = vpack.c.bf16 %v713_v2, %v712_v1  ;;  %v714_v4 = vld [vmem:[#allocation2 + $0xb0] sm:$0xff]  ;;  %v715_v5 = vld [vmem:[#allocation2 + $0xb8] sm:$0xff]  ;;  %v716_v7 = vld [vmem:[#allocation2 + $0xc0] sm:$0xff] }
  0x26   :  { %1797 = vmatprep.mubr.msk.f32.mxu0 %vm72_vm0, %v39_v20  ;;  %2094 = vmatprep.subr.bf16.mxu1 %v2093_v29  ;;  %v2121_v6 = vpack.c.bf16 %v715_v5, %v714_v4  ;;  %v717_v8 = vld [vmem:[#allocation2 + $0xc8] sm:$0xff]  ;;  %v718_v10 = vld [vmem:[#allocation2 + $0xd0] sm:$0xff]  ;;  %v719_v11 = vld [vmem:[#allocation2 + $0xd8] sm:$0xff] }
  0x27   :  { %2110 = vmatprep.subr.bf16.mxu0 %v2109_v62  ;;  %v2125_v9 = vpack.c.bf16 %v717_v8, %v716_v7  ;;  %v2129_v12 = vpack.c.bf16 %v719_v11, %v718_v10  ;;  %v720_v13 = vld [vmem:[#allocation2 + $0xe0] sm:$0xff]  ;;  %v721_v14 = vld [vmem:[#allocation2 + $0xe8] sm:$0xff]  ;;  %v722_v16 = vld [vmem:[#allocation2 + $0xf0] sm:$0xff] }
  0x28   :  { %2112 = vmatpush3.bf16.msra.mxu0 %v2109_v62  ;;  %v2133_v15 = vpack.c.bf16 %v721_v14, %v720_v13  ;;  %v723_v17 = vld [vmem:[#allocation2 + $0xf8] sm:$0xff]  ;;  %v2521_v19 = vld [vmem:[%s3057_s3] ss:$0 sm:$0xff] }
  0x29   :  { %1798 = vmatmul.mubr.msk.f32.gmra.mrb[8].mxu0 %vm72_vm0, %v40_v23  ;;  %2096 = vmatpush3.bf16.msra.mxu1 %v2093_v29  ;;  %v2137_v18 = vpack.c.bf16 %v723_v17, %v722_v16 }
  0x2a   :  { %1800 = vmatprep.mubr.msk.f32.mxu0 %vm72_vm0, %v41_v25  ;;  %2098 = vmatprep.subr.bf16.mxu1 %v2097_v34 }
  0x2b   :  { %2114 = vmatprep.subr.bf16.mxu0 %v2113_v0 }
  0x2c   :  { %2116 = vmatpush3.bf16.msra.mxu0 %v2113_v0 }
  0x2d   :  { %1801 = vmatmul.mubr.msk.f32.gmra.mrb[10].mxu0 %vm72_vm0, %v42_v28  ;;  %2100 = vmatpush3.bf16.msra.mxu1 %v2097_v34 }
  0x2e   :  { %1803 = vmatprep.mubr.msk.f32.mxu0 %vm72_vm0, %v43_v30  ;;  %2102 = vmatprep.subr.bf16.mxu1 %v2101_v39 }
  0x2f   :  { %2118 = vmatprep.subr.bf16.mxu0 %v2117_v3 }
  0x30   :  { %2120 = vmatpush3.bf16.msra.mxu0 %v2117_v3 }
  0x31   :  { %1804 = vmatmul.mubr.msk.f32.gmra.mrb[12].mxu0 %vm72_vm0, %v44_v33  ;;  %2104 = vmatpush3.bf16.msra.mxu1 %v2101_v39 }
  0x32   :  { %1806 = vmatprep.mubr.msk.f32.mxu0 %vm72_vm0, %v45_v35  ;;  %2106 = vmatprep.subr.bf16.mxu1 %v2105_v58 }
  0x33   :  { %2122 = vmatprep.subr.bf16.mxu0 %v2121_v6 }
  0x34   :  { %2124 = vmatpush3.bf16.msra.mxu0 %v2121_v6 }
  0x35   :  { %1807 = vmatmul.mubr.msk.f32.gmra.mrb[14].mxu0 %vm72_vm0, %v46_v38  ;;  %2108 = vmatpush3.bf16.msra.mxu1 %v2105_v58 }
  0x36   :  { %1809 = vmatprep.mubr.msk.f32.mxu0 %vm72_vm0, %v47_v40  ;;  %2126 = vmatprep.subr.bf16.mxu0 %v2125_v9 }
  0x38   :  { %2128 = vmatpush3.bf16.msra.mxu0 %v2125_v9 }
  0x39   :  { %1810 = vmatmul.mubr.msk.f32.gmra.mrb[16].mxu0 %vm72_vm0, %v48_v41  ;;  %2130 = vmatprep.subr.bf16.mxu0 %v2129_v12 }
  0x3a   :  { %1812 = vmatprep.mubr.msk.f32.mxu0 %vm72_vm0, %v49_v42 }
  0x3c   :  { %2132 = vmatpush3.bf16.msra.mxu0 %v2129_v12 }
  0x3d   :  { %1813 = vmatmul.mubr.msk.f32.gmra.mrb[18].mxu0 %vm72_vm0, %v50_v43  ;;  %2134 = vmatprep.subr.bf16.mxu0 %v2133_v15 }
  0x3e   :  { %1815 = vmatprep.mubr.msk.f32.mxu0 %vm72_vm0, %v51_v44 }
  0x40   :  { %2136 = vmatpush3.bf16.msra.mxu0 %v2133_v15 }
  0x41   :  { %1816 = vmatmul.mubr.msk.f32.gmra.mrb[20].mxu0 %vm72_vm0, %v52_v45  ;;  %2138 = vmatprep.subr.bf16.mxu0 %v2137_v18 }
  0x42   :  { %1818 = vmatprep.mubr.msk.f32.mxu0 %vm72_vm0, %v53_v46 }
  0x44   :  { %2140 = vmatpush3.bf16.msra.mxu0 %v2137_v18 }
  0x45   :  { %1819 = vmatmul.mubr.msk.f32.gmra.mrb[22].mxu0 %vm72_vm0, %v54_v47 }
  0x46   :  { %1821 = vmatprep.mubr.msk.f32.mxu0 %vm72_vm0, %v55_v48 }
  0x49   :  { %1822 = vmatmul.mubr.msk.f32.gmra.mrb[24].mxu0 %vm72_vm0, %v56_v49 }
  0x4a   :  { %1824 = vmatprep.mubr.msk.f32.mxu0 %vm72_vm0, %v57_v50 }
  0x4d   :  { %1825 = vmatmul.mubr.msk.f32.gmra.mrb[26].mxu0 %vm72_vm0, %v58_v51 }
  0x4e   :  { %1827 = vmatprep.mubr.msk.f32.mxu0 %vm72_vm0, %v59_v52 }
  0x51   :  { %1828 = vmatmul.mubr.msk.f32.gmra.mrb[28].mxu0 %vm72_vm0, %v60_v53 }
  0x52   :  { %1830 = vmatprep.mubr.msk.f32.mxu0 %vm72_vm0, %v61_v54 }
  0x55   :  { %1831 = vmatmul.mubr.msk.f32.gmra.mrb[30].mxu0 %vm72_vm0, %v62_v55 }
  0xec   :  { %v1787_v20 = vpop.f32.mrb[0].mxu0 }
  0xed   :  { %v241_v21 = vadd.f32 %v1787_v20, %v2521_v19  ;;  %v235_v22 = vpop.f32.mrb[1].mxu0 }
  0xee   :  { %v236_v23 = vadd.f32 %v2521_v19, %v235_v22 }
  0xef   :  { %v395_v26 = vmax.f32 %v241_v21, 0.0 }
  0xf0   :  { %v1790_v24 = vpop.f32.mrb[2].mxu0  ;;  %v394_v25 = vmax.f32 %v236_v23, 0.0 }
  0xf1   :  { %v251_v27 = vadd.f32 %v1790_v24, %v2521_v19  ;;  %v245_v28 = vpop.f32.mrb[3].mxu0 }
  0xf2   :  { %v246_v29 = vadd.f32 %v2521_v19, %v245_v28  ;;  %1865 = vmatprep.mubr.f32.mxu1 %v394_v25 }
  0xf3   :  { %1866 = vmatmul.mubr.f32.vlgmr.msra.gmra.mrb[0].mxu1 %v395_v26  ;;  %v397_v32 = vmax.f32 %v251_v27, 0.0 }
  0xf4   :  { %v396_v30 = vmax.f32 %v246_v29, 0.0  ;;  %v1793_v31 = vpop.f32.mrb[4].mxu0 }
  0xf5   :  { %v261_v33 = vadd.f32 %v1793_v31, %v2521_v19  ;;  %v255_v34 = vpop.f32.mrb[5].mxu0 }
  0xf6   :  { %v256_v35 = vadd.f32 %v2521_v19, %v255_v34  ;;  %1868 = vmatprep.mubr.f32.mxu1 %v396_v30 }
  0xf7   :  { %v399_v36 = vmax.f32 %v261_v33, 0.0  ;;  %1869 = vmatmul.mubr.f32.gmra.mrb[2].mxu1 %v397_v32 }
  0xf8   :  { %v398_v37 = vmax.f32 %v256_v35, 0.0  ;;  %v1796_v38 = vpop.f32.mrb[6].mxu0 }
  0xf9   :  { %v271_v39 = vadd.f32 %v1796_v38, %v2521_v19  ;;  %v265_v40 = vpop.f32.mrb[7].mxu0 }
  0xfa   :  { %v266_v41 = vadd.f32 %v2521_v19, %v265_v40  ;;  %1871 = vmatprep.mubr.f32.mxu1 %v398_v37 }
  0xfb   :  { %v401_v42 = vmax.f32 %v271_v39, 0.0  ;;  %1872 = vmatmul.mubr.f32.gmra.mrb[4].mxu1 %v399_v36 }
  0xfc   :  { %v400_v43 = vmax.f32 %v266_v41, 0.0  ;;  %v1799_v44 = vpop.f32.mrb[8].mxu0 }
  0xfd   :  { %v281_v45 = vadd.f32 %v1799_v44, %v2521_v19  ;;  %v275_v46 = vpop.f32.mrb[9].mxu0 }
  0xfe   :  { %v276_v47 = vadd.f32 %v2521_v19, %v275_v46  ;;  %1874 = vmatprep.mubr.f32.mxu1 %v400_v43 }
  0xff   :  { %v403_v48 = vmax.f32 %v281_v45, 0.0  ;;  %1875 = vmatmul.mubr.f32.gmra.mrb[6].mxu1 %v401_v42 }
 0x100   :  { %v402_v49 = vmax.f32 %v276_v47, 0.0  ;;  %v1802_v50 = vpop.f32.mrb[10].mxu0 }
 0x101   :  { %v291_v51 = vadd.f32 %v1802_v50, %v2521_v19  ;;  %v285_v52 = vpop.f32.mrb[11].mxu0 }
 0x102   :  { %v286_v53 = vadd.f32 %v2521_v19, %v285_v52  ;;  %1877 = vmatprep.mubr.f32.mxu1 %v402_v49 }
 0x103   :  { %v405_v54 = vmax.f32 %v291_v51, 0.0  ;;  %1878 = vmatmul.mubr.f32.gmra.mrb[8].mxu1 %v403_v48 }
 0x104   :  { %v404_v55 = vmax.f32 %v286_v53, 0.0  ;;  %v1805_v56 = vpop.f32.mrb[12].mxu0  ;;  %v990_v53 = vld [vmem:[#allocation2 + $0x100] sm:$0xff] }
 0x105   :  { %v301_v57 = vadd.f32 %v1805_v56, %v2521_v19  ;;  %v295_v58 = vpop.f32.mrb[13].mxu0 }
 0x106   :  { %v296_v59 = vadd.f32 %v2521_v19, %v295_v58  ;;  %1880 = vmatprep.mubr.f32.mxu1 %v404_v55  ;;  %v992_v55 = vld [vmem:[#allocation2 + $0x110] sm:$0xff] }
 0x107   :  { %v407_v60 = vmax.f32 %v301_v57, 0.0  ;;  %1881 = vmatmul.mubr.f32.gmra.mrb[10].mxu1 %v405_v54  ;;  %v991_v54 = vld [vmem:[#allocation2 + $0x108] sm:$0xff]  ;;  %v993_v57 = vld [vmem:[#allocation2 + $0x118] sm:$0xff] }
 0x108   :  { %v406_v61 = vmax.f32 %v296_v59, 0.0  ;;  %v1808_v62 = vpop.f32.mrb[14].mxu0  ;;  %v2141_v56 = vpack.c.bf16 %v991_v54, %v990_v53  ;;  %v2145_v58 = vpack.c.bf16 %v993_v57, %v992_v55  ;;  %v994_v59 = vld [vmem:[#allocation2 + $0x120] sm:$0xff] }
 0x109   :  { %v311_v63 = vadd.f32 %v1808_v62, %v2521_v19  ;;  %v305_v0 = vpop.f32.mrb[15].mxu0  ;;  %v997_v62 = vld [vmem:[#allocation2 + $0x138] sm:$0xff] }
 0x10a   :  { %v306_v1 = vadd.f32 %v2521_v19, %v305_v0  ;;  %1883 = vmatprep.mubr.f32.mxu1 %v406_v61  ;;  %2142 = vmatprep.subr.bf16.mxu0 %v2141_v56  ;;  %v998_v0 = vld [vmem:[#allocation2 + $0x140] sm:$0xff] }
 0x10b   :  { %v409_v2 = vmax.f32 %v311_v63, 0.0  ;;  %1884 = vmatmul.mubr.f32.gmra.mrb[12].mxu1 %v407_v60  ;;  %2173 = vmatprep.subr.bf16.mxu1 %v2141_v56  ;;  %v995_v60 = vld [vmem:[#allocation2 + $0x128] sm:$0xff] }
 0x10c   :  { %v408_v3 = vmax.f32 %v306_v1, 0.0  ;;  %v1811_v4 = vpop.f32.mrb[16].mxu0  ;;  %2181 = vmatpush3.bf16.msra.mxu1 %v2141_v56  ;;  %v2555_v61 = vpack.c.bf16 %v995_v60, %v994_v59  ;;  %v999_v1 = vld [vmem:[#allocation2 + $0x148] sm:$0xff] }
 0x10d   :  { %v321_v5 = vadd.f32 %v1811_v4, %v2521_v19  ;;  %v315_v6 = vpop.f32.mrb[17].mxu0  ;;  %2174 = vmatprep.subr.bf16.mxu1 %v2145_v58  ;;  %v1001_v4 = vld [vmem:[#allocation2 + $0x158] sm:$0xff] }
 0x10e   :  { %v316_v7 = vadd.f32 %v2521_v19, %v315_v6  ;;  %1886 = vmatprep.mubr.f32.mxu1 %v408_v3  ;;  %v1000_v3 = vld [vmem:[#allocation2 + $0x150] sm:$0xff]  ;;  %v1002_v6 = vld [vmem:[#allocation2 + $0x160] sm:$0xff] }
 0x10f   :  { %v411_v8 = vmax.f32 %v321_v5, 0.0  ;;  %1887 = vmatmul.mubr.f32.gmra.mrb[14].mxu1 %v409_v2  ;;  %v2562_v2 = vpack.c.bf16 %v999_v1, %v998_v0  ;;  %v2566_v5 = vpack.c.bf16 %v1001_v4, %v1000_v3 }
 0x110   :  { %v410_v9 = vmax.f32 %v316_v7, 0.0  ;;  %v1814_v10 = vpop.f32.mrb[18].mxu0  ;;  %2182 = vmatpush3.bf16.msra.mxu1 %v2145_v58  ;;  %v1003_v7 = vld [vmem:[#allocation2 + $0x168] sm:$0xff] }
 0x111   :  { %v331_v11 = vadd.f32 %v1814_v10, %v2521_v19  ;;  %v325_v12 = vpop.f32.mrb[19].mxu0  ;;  %2175 = vmatprep.subr.bf16.mxu1 %v2555_v61  ;;  %v1005_v10 = vld [vmem:[#allocation2 + $0x178] sm:$0xff] }
 0x112   :  { %v326_v13 = vadd.f32 %v2521_v19, %v325_v12  ;;  %1889 = vmatprep.mubr.f32.mxu1 %v410_v9  ;;  %v1004_v9 = vld [vmem:[#allocation2 + $0x170] sm:$0xff]  ;;  %v2582_v12 = vld [vmem:[%s3057_s3 + $0x1] ss:$0 sm:$0xff] }
 0x113   :  { %v413_v14 = vmax.f32 %v331_v11, 0.0  ;;  %1890 = vmatmul.mubr.f32.gmra.mrb[16].mxu1 %v411_v8  ;;  %v2570_v8 = vpack.c.bf16 %v1003_v7, %v1002_v6  ;;  %v2574_v11 = vpack.c.bf16 %v1005_v10, %v1004_v9 }
 0x114   :  { %v412_v15 = vmax.f32 %v326_v13, 0.0  ;;  %v1817_v16 = vpop.f32.mrb[20].mxu0  ;;  %2183 = vmatpush3.bf16.msra.mxu1 %v2555_v61 }
 0x115   :  { %v341_v17 = vadd.f32 %v1817_v16, %v2521_v19  ;;  %v335_v18 = vpop.f32.mrb[21].mxu0 }
 0x116   :  { %v336_v20 = vadd.f32 %v2521_v19, %v335_v18  ;;  %1892 = vmatprep.mubr.f32.mxu1 %v412_v15 }
 0x117   :  { %v415_v21 = vmax.f32 %v341_v17, 0.0  ;;  %1893 = vmatmul.mubr.f32.gmra.mrb[18].mxu1 %v413_v14 }
 0x118   :  { %v414_v22 = vmax.f32 %v336_v20, 0.0  ;;  %v1820_v23 = vpop.f32.mrb[22].mxu0 }
 0x119   :  { %v351_v24 = vadd.f32 %v1820_v23, %v2521_v19  ;;  %v345_v25 = vpop.f32.mrb[23].mxu0 }
 0x11a   :  { %v346_v26 = vadd.f32 %v2521_v19, %v345_v25  ;;  %1895 = vmatprep.mubr.f32.mxu1 %v414_v22 }
 0x11b   :  { %v417_v27 = vmax.f32 %v351_v24, 0.0  ;;  %1896 = vmatmul.mubr.f32.gmra.mrb[20].mxu1 %v415_v21 }
 0x11c   :  { %v416_v28 = vmax.f32 %v346_v26, 0.0  ;;  %v1823_v29 = vpop.f32.mrb[24].mxu0 }
 0x11d   :  { %v361_v30 = vadd.f32 %v1823_v29, %v2521_v19  ;;  %v355_v31 = vpop.f32.mrb[25].mxu0 }
 0x11e   :  { %v356_v32 = vadd.f32 %v2521_v19, %v355_v31  ;;  %1898 = vmatprep.mubr.f32.mxu1 %v416_v28 }
 0x11f   :  { %v419_v33 = vmax.f32 %v361_v30, 0.0  ;;  %1899 = vmatmul.mubr.f32.gmra.mrb[22].mxu1 %v417_v27 }
 0x120   :  { %v418_v34 = vmax.f32 %v356_v32, 0.0  ;;  %v1826_v35 = vpop.f32.mrb[26].mxu0 }
 0x121   :  { %v371_v36 = vadd.f32 %v1826_v35, %v2521_v19  ;;  %v365_v37 = vpop.f32.mrb[27].mxu0 }
 0x122   :  { %v366_v38 = vadd.f32 %v2521_v19, %v365_v37  ;;  %1901 = vmatprep.mubr.f32.mxu1 %v418_v34 }
 0x123   :  { %v421_v39 = vmax.f32 %v371_v36, 0.0  ;;  %1902 = vmatmul.mubr.f32.gmra.mrb[24].mxu1 %v419_v33 }
 0x124   :  { %v420_v40 = vmax.f32 %v366_v38, 0.0  ;;  %v1829_v41 = vpop.f32.mrb[28].mxu0 }
 0x125   :  { %v381_v42 = vadd.f32 %v1829_v41, %v2521_v19  ;;  %v375_v43 = vpop.f32.mrb[29].mxu0 }
 0x126   :  { %v376_v44 = vadd.f32 %v2521_v19, %v375_v43  ;;  %1904 = vmatprep.mubr.f32.mxu1 %v420_v40 }
 0x127   :  { %v423_v45 = vmax.f32 %v381_v42, 0.0  ;;  %1905 = vmatmul.mubr.f32.gmra.mrb[26].mxu1 %v421_v39 }
 0x128   :  { %v422_v46 = vmax.f32 %v376_v44, 0.0  ;;  %v1832_v47 = vpop.f32.mrb[30].mxu0 }
 0x129   :  { %v391_v48 = vadd.f32 %v1832_v47, %v2521_v19  ;;  %v385_v49 = vpop.f32.mrb[31].mxu0 }
 0x12a   :  { %v386_v50 = vadd.f32 %v2521_v19, %v385_v49  ;;  %1907 = vmatprep.mubr.f32.mxu1 %v422_v46  ;;  %v996_v19 = vld [vmem:[#allocation2 + $0x130] sm:$0xff] }
 0x12b   :  { %v425_v51 = vmax.f32 %v391_v48, 0.0  ;;  %1908 = vmatmul.mubr.f32.gmra.mrb[28].mxu1 %v423_v45  ;;  %v2558_v63 = vpack.c.bf16 %v997_v62, %v996_v19 }
 0x12c   :  { %v424_v52 = vmax.f32 %v386_v50, 0.0 }
 0x12d   :  { %2176 = vmatprep.subr.bf16.mxu1 %v2558_v63 }
 0x12e   :  { %1910 = vmatprep.mubr.f32.mxu1 %v424_v52  ;;  %2184 = vmatpush3.bf16.msra.mxu1 %v2558_v63 }
 0x12f   :  { %1911 = vmatmul.mubr.f32.gmra.mrb[30].mxu1 %v425_v51  ;;  %2177 = vmatprep.subr.bf16.mxu1 %v2562_v2 }
 0x132   :  { %2185 = vmatpush3.bf16.msra.mxu1 %v2562_v2 }
 0x133   :  { %2178 = vmatprep.subr.bf16.mxu1 %v2566_v5 }
 0x136   :  { %2186 = vmatpush3.bf16.msra.mxu1 %v2566_v5 }
 0x137   :  { %2179 = vmatprep.subr.bf16.mxu1 %v2570_v8 }
 0x13a   :  { %2187 = vmatpush3.bf16.msra.mxu1 %v2570_v8 }
 0x13b   :  { %2180 = vmatprep.subr.bf16.mxu1 %v2574_v11 }
 0x13e   :  { %2188 = vmatpush3.bf16.msra.mxu1 %v2574_v11 }
 0x1c6   :  { %v1867_v13 = vpop.f32.mrb[0].mxu1 }
 0x1c7   :  { %v522_v14 = vadd.f32 %v1867_v13, %v2582_v12  ;;  %v516_v15 = vpop.f32.mrb[1].mxu1 }
 0x1c8   :  { %v517_v16 = vadd.f32 %v2582_v12, %v516_v15 }
 0x1c9   :  { %v676_v20 = vmax.f32 %v522_v14, 0.0 }
 0x1ca   :  { %v675_v17 = vmax.f32 %v517_v16, 0.0  ;;  %v1870_v18 = vpop.f32.mrb[2].mxu1 }
 0x1cb   :  { %v532_v21 = vadd.f32 %v1870_v18, %v2582_v12  ;;  %v526_v22 = vpop.f32.mrb[3].mxu1 }
 0x1cc   :  { %v527_v23 = vadd.f32 %v2582_v12, %v526_v22  ;;  %1945 = vmatprep.mubr.f32.mxu0 %v675_v17 }
 0x1cd   :  { %1946 = vmatmul.mubr.f32.vlgmr.msra.gmra.mrb[32].mxu0 %v676_v20  ;;  %v678_v26 = vmax.f32 %v532_v21, 0.0 }
 0x1ce   :  { %v677_v24 = vmax.f32 %v527_v23, 0.0  ;;  %v1873_v25 = vpop.f32.mrb[4].mxu1  ;;  %2144 = vmatpush3.bf16.msra.mxu0 %v2141_v56 }
 0x1cf   :  { %v542_v27 = vadd.f32 %v1873_v25, %v2582_v12  ;;  %v536_v28 = vpop.f32.mrb[5].mxu1  ;;  %2146 = vmatprep.subr.bf16.mxu0 %v2145_v58 }
 0x1d0   :  { %v537_v29 = vadd.f32 %v2582_v12, %v536_v28  ;;  %1948 = vmatprep.mubr.f32.mxu0 %v677_v24 }
 0x1d1   :  { %v680_v30 = vmax.f32 %v542_v27, 0.0  ;;  %1949 = vmatmul.mubr.f32.gmra.mrb[34].mxu0 %v678_v26 }
 0x1d2   :  { %v679_v31 = vmax.f32 %v537_v29, 0.0  ;;  %v1876_v32 = vpop.f32.mrb[6].mxu1  ;;  %2148 = vmatpush3.bf16.msra.mxu0 %v2145_v58 }
 0x1d3   :  { %v552_v33 = vadd.f32 %v1876_v32, %v2582_v12  ;;  %v546_v34 = vpop.f32.mrb[7].mxu1  ;;  %2150 = vmatprep.subr.bf16.mxu0 %v2555_v61 }
 0x1d4   :  { %v547_v35 = vadd.f32 %v2582_v12, %v546_v34  ;;  %1951 = vmatprep.mubr.f32.mxu0 %v679_v31 }
 0x1d5   :  { %v682_v36 = vmax.f32 %v552_v33, 0.0  ;;  %1952 = vmatmul.mubr.f32.gmra.mrb[36].mxu0 %v680_v30 }
 0x1d6   :  { %v681_v37 = vmax.f32 %v547_v35, 0.0  ;;  %v1879_v38 = vpop.f32.mrb[8].mxu1  ;;  %2152 = vmatpush3.bf16.msra.mxu0 %v2555_v61 }
 0x1d7   :  { %v562_v39 = vadd.f32 %v1879_v38, %v2582_v12  ;;  %v556_v40 = vpop.f32.mrb[9].mxu1  ;;  %2154 = vmatprep.subr.bf16.mxu0 %v2558_v63 }
 0x1d8   :  { %v557_v41 = vadd.f32 %v2582_v12, %v556_v40  ;;  %1954 = vmatprep.mubr.f32.mxu0 %v681_v37 }
 0x1d9   :  { %v684_v42 = vmax.f32 %v562_v39, 0.0  ;;  %1955 = vmatmul.mubr.f32.gmra.mrb[38].mxu0 %v682_v36 }
 0x1da   :  { %v683_v43 = vmax.f32 %v557_v41, 0.0  ;;  %v1882_v44 = vpop.f32.mrb[10].mxu1  ;;  %2156 = vmatpush3.bf16.msra.mxu0 %v2558_v63 }
 0x1db   :  { %v572_v45 = vadd.f32 %v1882_v44, %v2582_v12  ;;  %v566_v46 = vpop.f32.mrb[11].mxu1  ;;  %2158 = vmatprep.subr.bf16.mxu0 %v2562_v2 }
 0x1dc   :  { %v567_v47 = vadd.f32 %v2582_v12, %v566_v46  ;;  %1957 = vmatprep.mubr.f32.mxu0 %v683_v43 }
 0x1dd   :  { %v686_v48 = vmax.f32 %v572_v45, 0.0  ;;  %1958 = vmatmul.mubr.f32.gmra.mrb[40].mxu0 %v684_v42 }
 0x1de   :  { %v685_v49 = vmax.f32 %v567_v47, 0.0  ;;  %v1885_v50 = vpop.f32.mrb[12].mxu1  ;;  %2160 = vmatpush3.bf16.msra.mxu0 %v2562_v2  ;;  %v2631_v47 = vld [vmem:[%s3057_s3 + $0x2] ss:$0 sm:$0xff] }
 0x1df   :  { %v582_v51 = vadd.f32 %v1885_v50, %v2582_v12  ;;  %v576_v52 = vpop.f32.mrb[13].mxu1  ;;  %2162 = vmatprep.subr.bf16.mxu0 %v2566_v5 }
 0x1e0   :  { %v577_v53 = vadd.f32 %v2582_v12, %v576_v52  ;;  %1960 = vmatprep.mubr.f32.mxu0 %v685_v49 }
 0x1e1   :  { %v688_v54 = vmax.f32 %v582_v51, 0.0  ;;  %1961 = vmatmul.mubr.f32.gmra.mrb[42].mxu0 %v686_v48 }
 0x1e2   :  { %v687_v55 = vmax.f32 %v577_v53, 0.0  ;;  %v1888_v56 = vpop.f32.mrb[14].mxu1  ;;  %2164 = vmatpush3.bf16.msra.mxu0 %v2566_v5 }
 0x1e3   :  { %v592_v57 = vadd.f32 %v1888_v56, %v2582_v12  ;;  %v586_v58 = vpop.f32.mrb[15].mxu1  ;;  %2166 = vmatprep.subr.bf16.mxu0 %v2570_v8 }
 0x1e4   :  { %v587_v59 = vadd.f32 %v2582_v12, %v586_v58  ;;  %1963 = vmatprep.mubr.f32.mxu0 %v687_v55 }
 0x1e5   :  { %v690_v60 = vmax.f32 %v592_v57, 0.0  ;;  %1964 = vmatmul.mubr.f32.gmra.mrb[44].mxu0 %v688_v54 }
 0x1e6   :  { %v689_v61 = vmax.f32 %v587_v59, 0.0  ;;  %v1891_v19 = vpop.f32.mrb[16].mxu1  ;;  %2168 = vmatpush3.bf16.msra.mxu0 %v2570_v8 }
 0x1e7   :  { %v602_v62 = vadd.f32 %v1891_v19, %v2582_v12  ;;  %v596_v63 = vpop.f32.mrb[17].mxu1  ;;  %2170 = vmatprep.subr.bf16.mxu0 %v2574_v11 }
 0x1e8   :  { %v597_v0 = vadd.f32 %v2582_v12, %v596_v63  ;;  %1966 = vmatprep.mubr.f32.mxu0 %v689_v61 }
 0x1e9   :  { %v692_v1 = vmax.f32 %v602_v62, 0.0  ;;  %1967 = vmatmul.mubr.f32.gmra.mrb[46].mxu0 %v690_v60 }
 0x1ea   :  { %v691_v2 = vmax.f32 %v597_v0, 0.0  ;;  %v1894_v3 = vpop.f32.mrb[18].mxu1  ;;  %2172 = vmatpush3.bf16.msra.mxu0 %v2574_v11 }
 0x1eb   :  { %v612_v4 = vadd.f32 %v1894_v3, %v2582_v12  ;;  %v606_v5 = vpop.f32.mrb[19].mxu1 }
 0x1ec   :  { %v607_v6 = vadd.f32 %v2582_v12, %v606_v5  ;;  %1969 = vmatprep.mubr.f32.mxu0 %v691_v2 }
 0x1ed   :  { %v694_v7 = vmax.f32 %v612_v4, 0.0  ;;  %1970 = vmatmul.mubr.f32.gmra.mrb[48].mxu0 %v692_v1 }
 0x1ee   :  { %v693_v8 = vmax.f32 %v607_v6, 0.0  ;;  %v1897_v9 = vpop.f32.mrb[20].mxu1 }
 0x1ef   :  { %v622_v10 = vadd.f32 %v1897_v9, %v2582_v12  ;;  %v616_v13 = vpop.f32.mrb[21].mxu1 }
 0x1f0   :  { %v617_v14 = vadd.f32 %v2582_v12, %v616_v13  ;;  %1972 = vmatprep.mubr.f32.mxu0 %v693_v8 }
 0x1f1   :  { %v696_v15 = vmax.f32 %v622_v10, 0.0  ;;  %1973 = vmatmul.mubr.f32.gmra.mrb[50].mxu0 %v694_v7 }
 0x1f2   :  { %v695_v16 = vmax.f32 %v617_v14, 0.0  ;;  %v1900_v11 = vpop.f32.mrb[22].mxu1 }
 0x1f3   :  { %v632_v17 = vadd.f32 %v1900_v11, %v2582_v12  ;;  %v626_v18 = vpop.f32.mrb[23].mxu1 }
 0x1f4   :  { %v627_v20 = vadd.f32 %v2582_v12, %v626_v18  ;;  %1975 = vmatprep.mubr.f32.mxu0 %v695_v16 }
 0x1f5   :  { %v698_v21 = vmax.f32 %v632_v17, 0.0  ;;  %1976 = vmatmul.mubr.f32.gmra.mrb[52].mxu0 %v696_v15 }
 0x1f6   :  { %v697_v22 = vmax.f32 %v627_v20, 0.0  ;;  %v1903_v23 = vpop.f32.mrb[24].mxu1 }
 0x1f7   :  { %v642_v24 = vadd.f32 %v1903_v23, %v2582_v12  ;;  %v636_v25 = vpop.f32.mrb[25].mxu1 }
 0x1f8   :  { %v637_v26 = vadd.f32 %v2582_v12, %v636_v25  ;;  %1978 = vmatprep.mubr.f32.mxu0 %v697_v22 }
 0x1f9   :  { %v700_v27 = vmax.f32 %v642_v24, 0.0  ;;  %1979 = vmatmul.mubr.f32.gmra.mrb[54].mxu0 %v698_v21 }
 0x1fa   :  { %v699_v28 = vmax.f32 %v637_v26, 0.0  ;;  %v1906_v29 = vpop.f32.mrb[26].mxu1 }
 0x1fb   :  { %v652_v30 = vadd.f32 %v1906_v29, %v2582_v12  ;;  %v646_v31 = vpop.f32.mrb[27].mxu1 }
 0x1fc   :  { %v647_v32 = vadd.f32 %v2582_v12, %v646_v31  ;;  %1981 = vmatprep.mubr.f32.mxu0 %v699_v28 }
 0x1fd   :  { %v702_v33 = vmax.f32 %v652_v30, 0.0  ;;  %1982 = vmatmul.mubr.f32.gmra.mrb[56].mxu0 %v700_v27 }
 0x1fe   :  { %v701_v34 = vmax.f32 %v647_v32, 0.0  ;;  %v1909_v35 = vpop.f32.mrb[28].mxu1 }
 0x1ff   :  { %v662_v36 = vadd.f32 %v1909_v35, %v2582_v12  ;;  %v656_v37 = vpop.f32.mrb[29].mxu1 }
 0x200   :  { %v657_v38 = vadd.f32 %v2582_v12, %v656_v37  ;;  %1984 = vmatprep.mubr.f32.mxu0 %v701_v34 }
 0x201   :  { %v704_v39 = vmax.f32 %v662_v36, 0.0  ;;  %1985 = vmatmul.mubr.f32.gmra.mrb[58].mxu0 %v702_v33 }
 0x202   :  { %v703_v40 = vmax.f32 %v657_v38, 0.0  ;;  %v1912_v41 = vpop.f32.mrb[30].mxu1 }
 0x203   :  { %v672_v42 = vadd.f32 %v1912_v41, %v2582_v12  ;;  %v666_v43 = vpop.f32.mrb[31].mxu1 }
 0x204   :  { %v667_v44 = vadd.f32 %v2582_v12, %v666_v43  ;;  %1987 = vmatprep.mubr.f32.mxu0 %v703_v40 }
 0x205   :  { %v706_v45 = vmax.f32 %v672_v42, 0.0  ;;  %1988 = vmatmul.mubr.f32.gmra.mrb[60].mxu0 %v704_v39 }
 0x206   :  { %v705_v46 = vmax.f32 %v667_v44, 0.0 }
 0x208   :  { %1990 = vmatprep.mubr.f32.mxu0 %v705_v46 }
 0x209   :  { %1991 = vmatmul.mubr.f32.gmra.mrb[62].mxu0 %v706_v45 }
 0x2a0   :  { %v1947_v48 = vpop.f32.mrb[32].mxu0 }
 0x2a1   :  { %v804_v49 = vadd.f32 %v1947_v48, %v2631_v47  ;;  %v798_v50 = vpop.f32.mrb[33].mxu0 }
 0x2a2   :  { %v799_v51 = vadd.f32 %v2631_v47, %v798_v50 }
 0x2a3   :  { %v958_v12 = vmax.f32 %v804_v49, 0.0 }
 0x2a4   :  { %v957_v52 = vmax.f32 %v799_v51, 0.0  ;;  %v1950_v53 = vpop.f32.mrb[34].mxu0 }
 0x2a5   :  { %v814_v54 = vadd.f32 %v1950_v53, %v2631_v47  ;;  %v808_v55 = vpop.f32.mrb[35].mxu0 }
 0x2a6   :  { %v809_v56 = vadd.f32 %v2631_v47, %v808_v55  ;;  %2025 = vmatprep.mubr.f32.mxu0 %v957_v52 }
 0x2a7   :  { %2026 = vmatmul.mubr.f32.vlgmr.msra.gmra.mrb[64].mxu0 %v958_v12  ;;  %v960_v59 = vmax.f32 %v814_v54, 0.0 }
 0x2a8   :  { %v959_v57 = vmax.f32 %v809_v56, 0.0  ;;  %v1953_v58 = vpop.f32.mrb[36].mxu0 }
 0x2a9   :  { %v824_v60 = vadd.f32 %v1953_v58, %v2631_v47  ;;  %v818_v61 = vpop.f32.mrb[37].mxu0 }
 0x2aa   :  { %v819_v19 = vadd.f32 %v2631_v47, %v818_v61  ;;  %2028 = vmatprep.mubr.f32.mxu0 %v959_v57 }
 0x2ab   :  { %2029 = vmatmul.mubr.f32.gmra.mrb[66].mxu0 %v960_v59  ;;  %v962_v0 = vmax.f32 %v824_v60, 0.0 }
 0x2ac   :  { %v961_v62 = vmax.f32 %v819_v19, 0.0  ;;  %v1956_v63 = vpop.f32.mrb[38].mxu0 }
 0x2ad   :  { %v834_v1 = vadd.f32 %v1956_v63, %v2631_v47  ;;  %v828_v2 = vpop.f32.mrb[39].mxu0 }
 0x2ae   :  { %v829_v3 = vadd.f32 %v2631_v47, %v828_v2  ;;  %2031 = vmatprep.mubr.f32.mxu0 %v961_v62 }
 0x2af   :  { %2032 = vmatmul.mubr.f32.gmra.mrb[68].mxu0 %v962_v0  ;;  %v964_v6 = vmax.f32 %v834_v1, 0.0 }
 0x2b0   :  { %v963_v4 = vmax.f32 %v829_v3, 0.0  ;;  %v1959_v5 = vpop.f32.mrb[40].mxu0 }
 0x2b1   :  { %v844_v7 = vadd.f32 %v1959_v5, %v2631_v47  ;;  %v838_v8 = vpop.f32.mrb[41].mxu0 }
 0x2b2   :  { %v839_v9 = vadd.f32 %v2631_v47, %v838_v8  ;;  %2034 = vmatprep.mubr.f32.mxu1 %v963_v4 }
 0x2b3   :  { %2035 = vmatmul.mubr.f32.vlgmr.msra.gmra.mrb[32].mxu1 %v964_v6  ;;  %v966_v14 = vmax.f32 %v844_v7, 0.0 }
 0x2b4   :  { %v965_v10 = vmax.f32 %v839_v9, 0.0  ;;  %v1962_v13 = vpop.f32.mrb[42].mxu0 }
 0x2b5   :  { %v854_v15 = vadd.f32 %v1962_v13, %v2631_v47  ;;  %v848_v16 = vpop.f32.mrb[43].mxu0 }
 0x2b6   :  { %v849_v11 = vadd.f32 %v2631_v47, %v848_v16  ;;  %2037 = vmatprep.mubr.f32.mxu1 %v965_v10 }
 0x2b7   :  { %2038 = vmatmul.mubr.f32.gmra.mrb[34].mxu1 %v966_v14  ;;  %v968_v20 = vmax.f32 %v854_v15, 0.0 }
 0x2b8   :  { %v967_v17 = vmax.f32 %v849_v11, 0.0  ;;  %v1965_v18 = vpop.f32.mrb[44].mxu0  ;;  %v2668_v11 = vld [vmem:[%s3057_s3 + $0x3] ss:$0 sm:$0xff] }
 0x2b9   :  { %v864_v21 = vadd.f32 %v1965_v18, %v2631_v47  ;;  %v858_v22 = vpop.f32.mrb[45].mxu0 }
 0x2ba   :  { %v859_v23 = vadd.f32 %v2631_v47, %v858_v22  ;;  %2040 = vmatprep.mubr.f32.mxu1 %v967_v17 }
 0x2bb   :  { %2041 = vmatmul.mubr.f32.gmra.mrb[36].mxu1 %v968_v20  ;;  %v970_v26 = vmax.f32 %v864_v21, 0.0 }
 0x2bc   :  { %v969_v24 = vmax.f32 %v859_v23, 0.0  ;;  %v1968_v25 = vpop.f32.mrb[46].mxu0 }
 0x2bd   :  { %v874_v27 = vadd.f32 %v1968_v25, %v2631_v47  ;;  %v868_v28 = vpop.f32.mrb[47].mxu0 }
 0x2be   :  { %v869_v29 = vadd.f32 %v2631_v47, %v868_v28  ;;  %2043 = vmatprep.mubr.f32.mxu1 %v969_v24 }
 0x2bf   :  { %2044 = vmatmul.mubr.f32.gmra.mrb[38].mxu1 %v970_v26  ;;  %v972_v32 = vmax.f32 %v874_v27, 0.0 }
 0x2c0   :  { %v971_v30 = vmax.f32 %v869_v29, 0.0  ;;  %v1971_v31 = vpop.f32.mrb[48].mxu0 }
 0x2c1   :  { %v884_v33 = vadd.f32 %v1971_v31, %v2631_v47  ;;  %v878_v34 = vpop.f32.mrb[49].mxu0 }
 0x2c2   :  { %v879_v35 = vadd.f32 %v2631_v47, %v878_v34  ;;  %2046 = vmatprep.mubr.f32.mxu1 %v971_v30 }
 0x2c3   :  { %2047 = vmatmul.mubr.f32.gmra.mrb[40].mxu1 %v972_v32  ;;  %v974_v38 = vmax.f32 %v884_v33, 0.0 }
 0x2c4   :  { %v973_v36 = vmax.f32 %v879_v35, 0.0  ;;  %v1974_v37 = vpop.f32.mrb[50].mxu0 }
 0x2c5   :  { %v894_v39 = vadd.f32 %v1974_v37, %v2631_v47  ;;  %v888_v40 = vpop.f32.mrb[51].mxu0 }
 0x2c6   :  { %v889_v41 = vadd.f32 %v2631_v47, %v888_v40  ;;  %2049 = vmatprep.mubr.f32.mxu1 %v973_v36 }
 0x2c7   :  { %2050 = vmatmul.mubr.f32.gmra.mrb[42].mxu1 %v974_v38  ;;  %v976_v44 = vmax.f32 %v894_v39, 0.0 }
 0x2c8   :  { %v975_v42 = vmax.f32 %v889_v41, 0.0  ;;  %v1977_v43 = vpop.f32.mrb[52].mxu0 }
 0x2c9   :  { %v904_v45 = vadd.f32 %v1977_v43, %v2631_v47  ;;  %v898_v46 = vpop.f32.mrb[53].mxu0 }
 0x2ca   :  { %v899_v48 = vadd.f32 %v2631_v47, %v898_v46  ;;  %2052 = vmatprep.mubr.f32.mxu1 %v975_v42 }
 0x2cb   :  { %2053 = vmatmul.mubr.f32.gmra.mrb[44].mxu1 %v976_v44  ;;  %v978_v51 = vmax.f32 %v904_v45, 0.0 }
 0x2cc   :  { %v977_v49 = vmax.f32 %v899_v48, 0.0  ;;  %v1980_v50 = vpop.f32.mrb[54].mxu0 }
 0x2cd   :  { %v914_v52 = vadd.f32 %v1980_v50, %v2631_v47  ;;  %v908_v53 = vpop.f32.mrb[55].mxu0 }
 0x2ce   :  { %v909_v12 = vadd.f32 %v2631_v47, %v908_v53  ;;  %2055 = vmatprep.mubr.f32.mxu1 %v977_v49 }
 0x2cf   :  { %2056 = vmatmul.mubr.f32.gmra.mrb[46].mxu1 %v978_v51  ;;  %v980_v56 = vmax.f32 %v914_v52, 0.0 }
 0x2d0   :  { %v979_v54 = vmax.f32 %v909_v12, 0.0  ;;  %v1983_v55 = vpop.f32.mrb[56].mxu0 }
 0x2d1   :  { %v924_v57 = vadd.f32 %v1983_v55, %v2631_v47  ;;  %v918_v58 = vpop.f32.mrb[57].mxu0 }
 0x2d2   :  { %v919_v59 = vadd.f32 %v2631_v47, %v918_v58  ;;  %2058 = vmatprep.mubr.f32.mxu1 %v979_v54 }
 0x2d3   :  { %2059 = vmatmul.mubr.f32.gmra.mrb[48].mxu1 %v980_v56  ;;  %v982_v19 = vmax.f32 %v924_v57, 0.0 }
 0x2d4   :  { %v981_v60 = vmax.f32 %v919_v59, 0.0  ;;  %v1986_v61 = vpop.f32.mrb[58].mxu0 }
 0x2d5   :  { %v934_v62 = vadd.f32 %v1986_v61, %v2631_v47  ;;  %v928_v63 = vpop.f32.mrb[59].mxu0 }
 0x2d6   :  { %v929_v0 = vadd.f32 %v2631_v47, %v928_v63  ;;  %2061 = vmatprep.mubr.f32.mxu1 %v981_v60 }
 0x2d7   :  { %2062 = vmatmul.mubr.f32.gmra.mrb[50].mxu1 %v982_v19  ;;  %v984_v3 = vmax.f32 %v934_v62, 0.0 }
 0x2d8   :  { %v983_v1 = vmax.f32 %v929_v0, 0.0  ;;  %v1989_v2 = vpop.f32.mrb[60].mxu0 }
 0x2d9   :  { %v944_v4 = vadd.f32 %v1989_v2, %v2631_v47  ;;  %v938_v5 = vpop.f32.mrb[61].mxu0 }
 0x2da   :  { %v939_v6 = vadd.f32 %v2631_v47, %v938_v5  ;;  %2064 = vmatprep.mubr.f32.mxu1 %v983_v1 }
 0x2db   :  { %2065 = vmatmul.mubr.f32.gmra.mrb[52].mxu1 %v984_v3  ;;  %v986_v9 = vmax.f32 %v944_v4, 0.0 }
 0x2dc   :  { %v985_v7 = vmax.f32 %v939_v6, 0.0  ;;  %v1992_v8 = vpop.f32.mrb[62].mxu0 }
 0x2dd   :  { %v954_v10 = vadd.f32 %v1992_v8, %v2631_v47  ;;  %v948_v13 = vpop.f32.mrb[63].mxu0 }
 0x2de   :  { %v949_v14 = vadd.f32 %v2631_v47, %v948_v13  ;;  %2067 = vmatprep.mubr.f32.mxu1 %v985_v7 }
 0x2df   :  { %2068 = vmatmul.mubr.f32.gmra.mrb[54].mxu1 %v986_v9  ;;  %v988_v16 = vmax.f32 %v954_v10, 0.0 }
 0x2e0   :  { %v987_v15 = vmax.f32 %v949_v14, 0.0 }
 0x2e2   :  { %2070 = vmatprep.mubr.f32.mxu1 %v987_v15 }
 0x2e3   :  { %2071 = vmatmul.mubr.f32.gmra.mrb[56].mxu1 %v988_v16 }
 0x37a   :  { %v2027_v17 = vpop.f32.mrb[64].mxu0 }
 0x37b   :  { %v2671_v18 = vadd.f32 %v2027_v17, %v2668_v11  ;;  %v1080_v20 = vpop.f32.mrb[65].mxu0 }
 0x37c   :  { %v2675_v47 = vadd.f32 %v2668_v11, %v1080_v20 }
 0x37d   :  { %1241 = vmax.xlane.f32.xlu0 %v2671_v18 }
 0x37e   :  { %v2030_v21 = vpop.f32.mrb[66].mxu0 }
 0x37f   :  { %v2678_v22 = vadd.f32 %v2030_v21, %v2668_v11  ;;  %v1090_v23 = vpop.f32.mrb[67].mxu0 }
 0x380   :  { %v2683_v25 = vadd.f32 %v2668_v11, %v1090_v23 }
 0x381   :  { %1245 = vmax.xlane.f32.xlu1 %v2678_v22  ;;  %1239 = vmax.xlane.f32.xlu0 %v2675_v47 }
 0x382   :  { %v2033_v24 = vpop.f32.mrb[68].mxu0 }
 0x383   :  { %v1100_v26 = vpop.f32.mrb[69].mxu0  ;;  %v2691_v29 = vadd.f32 %v2033_v24, %v2668_v11 }
 0x384   :  { %v2686_v27 = vadd.f32 %v2668_v11, %v1100_v26 }
 0x385   :  { %1243 = vmax.xlane.f32.xlu1 %v2683_v25 }
 0x386   :  { %v2036_v28 = vpop.f32.mrb[32].mxu1  ;;  %1247 = vmax.xlane.f32.xlu0 %v2686_v27 }
 0x387   :  { %v1110_v30 = vpop.f32.mrb[33].mxu1  ;;  %v2699_v33 = vadd.f32 %v2036_v28, %v2668_v11 }
 0x388   :  { %v2694_v31 = vadd.f32 %v2668_v11, %v1110_v30 }
 0x389   :  { %1249 = vmax.xlane.f32.xlu1 %v2691_v29 }
 0x38a   :  { %v2039_v32 = vpop.f32.mrb[34].mxu1  ;;  %1251 = vmax.xlane.f32.xlu0 %v2694_v31 }
 0x38b   :  { %v1120_v34 = vpop.f32.mrb[35].mxu1  ;;  %v2707_v37 = vadd.f32 %v2039_v32, %v2668_v11 }
 0x38c   :  { %v2702_v35 = vadd.f32 %v2668_v11, %v1120_v34 }
 0x38d   :  { %1253 = vmax.xlane.f32.xlu1 %v2699_v33 }
 0x38e   :  { %v2042_v36 = vpop.f32.mrb[36].mxu1  ;;  %1255 = vmax.xlane.f32.xlu0 %v2702_v35 }
 0x38f   :  { %v1130_v38 = vpop.f32.mrb[37].mxu1  ;;  %v2715_v41 = vadd.f32 %v2042_v36, %v2668_v11 }
 0x390   :  { %v2710_v39 = vadd.f32 %v2668_v11, %v1130_v38 }
 0x391   :  { %1257 = vmax.xlane.f32.xlu1 %v2707_v37 }
 0x392   :  { %v2045_v40 = vpop.f32.mrb[38].mxu1  ;;  %1259 = vmax.xlane.f32.xlu0 %v2710_v39 }
 0x393   :  { %v1140_v42 = vpop.f32.mrb[39].mxu1  ;;  %v2723_v45 = vadd.f32 %v2045_v40, %v2668_v11 }
 0x394   :  { %v2718_v43 = vadd.f32 %v2668_v11, %v1140_v42 }
 0x395   :  { %1261 = vmax.xlane.f32.xlu1 %v2715_v41 }
 0x396   :  { %v2048_v44 = vpop.f32.mrb[40].mxu1  ;;  %1263 = vmax.xlane.f32.xlu0 %v2718_v43 }
 0x397   :  { %v1150_v46 = vpop.f32.mrb[41].mxu1  ;;  %v2731_v50 = vadd.f32 %v2048_v44, %v2668_v11 }
 0x398   :  { %v2726_v48 = vadd.f32 %v2668_v11, %v1150_v46 }
 0x399   :  { %1265 = vmax.xlane.f32.xlu1 %v2723_v45 }
 0x39a   :  { %v2051_v49 = vpop.f32.mrb[42].mxu1  ;;  %1267 = vmax.xlane.f32.xlu0 %v2726_v48 }
 0x39b   :  { %v1160_v51 = vpop.f32.mrb[43].mxu1  ;;  %v2739_v12 = vadd.f32 %v2051_v49, %v2668_v11 }
 0x39c   :  { %v2734_v52 = vadd.f32 %v2668_v11, %v1160_v51 }
 0x39d   :  { %1269 = vmax.xlane.f32.xlu1 %v2731_v50 }
 0x39e   :  { %v2054_v53 = vpop.f32.mrb[44].mxu1  ;;  %1271 = vmax.xlane.f32.xlu0 %v2734_v52 }
 0x39f   :  { %v1170_v54 = vpop.f32.mrb[45].mxu1  ;;  %v2747_v57 = vadd.f32 %v2054_v53, %v2668_v11 }
 0x3a0   :  { %v2742_v55 = vadd.f32 %v2668_v11, %v1170_v54 }
 0x3a1   :  { %1273 = vmax.xlane.f32.xlu1 %v2739_v12 }
 0x3a2   :  { %v2057_v56 = vpop.f32.mrb[46].mxu1  ;;  %1275 = vmax.xlane.f32.xlu0 %v2742_v55 }
 0x3a3   :  { %v1180_v58 = vpop.f32.mrb[47].mxu1  ;;  %v2755_v61 = vadd.f32 %v2057_v56, %v2668_v11 }
 0x3a4   :  { %v2750_v59 = vadd.f32 %v2668_v11, %v1180_v58 }
 0x3a5   :  { %1277 = vmax.xlane.f32.xlu1 %v2747_v57 }
 0x3a6   :  { %v2060_v60 = vpop.f32.mrb[48].mxu1  ;;  %1279 = vmax.xlane.f32.xlu0 %v2750_v59 }
 0x3a7   :  { %v1190_v19 = vpop.f32.mrb[49].mxu1  ;;  %v2763_v0 = vadd.f32 %v2060_v60, %v2668_v11 }
 0x3a8   :  { %v2758_v62 = vadd.f32 %v2668_v11, %v1190_v19 }
 0x3a9   :  { %1281 = vmax.xlane.f32.xlu1 %v2755_v61 }
 0x3aa   :  { %v2063_v63 = vpop.f32.mrb[50].mxu1  ;;  %1283 = vmax.xlane.f32.xlu0 %v2758_v62 }
 0x3ab   :  { %v1200_v1 = vpop.f32.mrb[51].mxu1  ;;  %v2771_v4 = vadd.f32 %v2063_v63, %v2668_v11 }
 0x3ac   :  { %v2766_v2 = vadd.f32 %v2668_v11, %v1200_v1 }
 0x3ad   :  { %1285 = vmax.xlane.f32.xlu1 %v2763_v0 }
 0x3ae   :  { %v2066_v3 = vpop.f32.mrb[52].mxu1  ;;  %1287 = vmax.xlane.f32.xlu0 %v2766_v2 }
 0x3af   :  { %v1210_v5 = vpop.f32.mrb[53].mxu1  ;;  %v2779_v8 = vadd.f32 %v2066_v3, %v2668_v11 }
 0x3b0   :  { %v2774_v6 = vadd.f32 %v2668_v11, %v1210_v5 }
 0x3b1   :  { %1289 = vmax.xlane.f32.xlu1 %v2771_v4 }
 0x3b2   :  { %v2069_v7 = vpop.f32.mrb[54].mxu1  ;;  %1291 = vmax.xlane.f32.xlu0 %v2774_v6 }
 0x3b3   :  { %v1220_v9 = vpop.f32.mrb[55].mxu1  ;;  %v2787_v14 = vadd.f32 %v2069_v7, %v2668_v11 }
 0x3b4   :  { %v2782_v10 = vadd.f32 %v2668_v11, %v1220_v9 }
 0x3b5   :  { %1293 = vmax.xlane.f32.xlu1 %v2779_v8 }
 0x3b6   :  { %v2072_v13 = vpop.f32.mrb[56].mxu1  ;;  %1295 = vmax.xlane.f32.xlu0 %v2782_v10 }
 0x3b7   :  { %v2790_v15 = vadd.f32 %v2072_v13, %v2668_v11  ;;  %v1230_v16 = vpop.f32.mrb[57].mxu1 }
 0x3b8   :  { %v2793_v17 = vadd.f32 %v2668_v11, %v1230_v16 }
 0x3b9   :  { %1297 = vmax.xlane.f32.xlu1 %v2787_v14 }
 0x3ba   :  { %1299 = vmax.xlane.f32.xlu0 %v2793_v17 }
 0x3bd   :  { %1301 = vmax.xlane.f32.xlu1 %v2790_v15 }
 0x40a   :  { %v1242_v20 = vpop.xlane.xlu0 %1241 }
 0x40b   :  { %v1304_v21 = vsub.f32 %v2671_v18, %v1242_v20 }
 0x40d   :  { %v1337_v23 = vmul.f32 1.442695, %v1304_v21 }
 0x40e   :  { %v1246_v24 = vpop.xlane.xlu1 %1245  ;;  %v1240_v26 = vpop.xlane.xlu0 %1239 }
 0x40f   :  { %2192 = vpow2.f32 %v1337_v23  ;;  %v1306_v28 = vsub.f32 %v2678_v22, %v1246_v24  ;;  %v1303_v30 = vsub.f32 %v2675_v47, %v1240_v26 }
 0x411   :  { %v1341_v32 = vmul.f32 1.442695, %v1306_v28  ;;  %v1335_v11 = vmul.f32 1.442695, %v1303_v30 }
 0x412   :  { %v1244_v34 = vpop.xlane.xlu1 %1243 }
 0x413   :  { %2194 = vpow2.f32 %v1341_v32  ;;  %v1305_v36 = vsub.f32 %v2683_v25, %v1244_v34  ;;  %v1248_v38 = vpop.xlane.xlu0 %1247 }
 0x414   :  { %2196 = vpow2.f32 %v1335_v11  ;;  %v1307_v40 = vsub.f32 %v2686_v27, %v1248_v38 }
 0x415   :  { %v1339_v42 = vmul.f32 1.442695, %v1305_v36 }
 0x416   :  { %v1250_v18 = vpop.xlane.xlu1 %1249  ;;  %v1343_v49 = vmul.f32 1.442695, %v1307_v40 }
 0x417   :  { %2198 = vpow2.f32 %v1339_v42  ;;  %v1308_v44 = vsub.f32 %v2691_v29, %v1250_v18  ;;  %v1252_v46 = vpop.xlane.xlu0 %1251 }
 0x418   :  { %v1309_v22 = vsub.f32 %v2694_v31, %v1252_v46 }
 0x419   :  { %v2805_v47 = vpop.eup %2192  ;;  %v1345_v51 = vmul.f32 1.442695, %v1308_v44 }
 0x41a   :  { %1401 = vadd.xlane.f32.xlu1 %v2805_v47  ;;  %v1254_v53 = vpop.xlane.xlu1 %1253  ;;  %v1347_v27 = vmul.f32 1.442695, %v1309_v22 }
 0x41b   :  { %2200 = vpow2.f32 %v1345_v51  ;;  %v1310_v25 = vsub.f32 %v2699_v33, %v1254_v53  ;;  %v1256_v54 = vpop.xlane.xlu0 %1255 }
 0x41c   :  { %2202 = vpow2.f32 %v1343_v49  ;;  %v1311_v56 = vsub.f32 %v2702_v35, %v1256_v54 }
 0x41d   :  { %v2810_v58 = vpop.eup %2194  ;;  %v1349_v29 = vmul.f32 1.442695, %v1310_v25 }
 0x41e   :  { %v2812_v60 = vpop.eup %2196  ;;  %1405 = vadd.xlane.f32.xlu1 %v2810_v58  ;;  %v1258_v31 = vpop.xlane.xlu1 %1257  ;;  %v1351_v33 = vmul.f32 1.442695, %v1311_v56 }
 0x41f   :  { %2204 = vpow2.f32 %v1349_v29  ;;  %v1312_v19 = vsub.f32 %v2707_v37, %v1258_v31  ;;  %1399 = vadd.xlane.f32.xlu0 %v2812_v60  ;;  %v1260_v63 = vpop.xlane.xlu0 %1259 }
 0x420   :  { %2206 = vpow2.f32 %v1347_v27  ;;  %v1313_v1 = vsub.f32 %v2710_v39, %v1260_v63 }
 0x421   :  { %v2818_v3 = vpop.eup %2198  ;;  %v1353_v35 = vmul.f32 1.442695, %v1312_v19 }
 0x422   :  { %v1262_v5 = vpop.xlane.xlu1 %1261  ;;  %v1355_v13 = vmul.f32 1.442695, %v1313_v1 }
 0x423   :  { %2208 = vpow2.f32 %v1353_v35  ;;  %v1314_v7 = vsub.f32 %v2715_v41, %v1262_v5  ;;  %1403 = vadd.xlane.f32.xlu0 %v2818_v3  ;;  %v1264_v9 = vpop.xlane.xlu0 %1263 }
 0x424   :  { %2210 = vpow2.f32 %v1351_v33  ;;  %v1315_v37 = vsub.f32 %v2718_v43, %v1264_v9 }
 0x425   :  { %v2823_v16 = vpop.eup %2200  ;;  %v1357_v20 = vmul.f32 1.442695, %v1314_v7 }
 0x426   :  { %v2825_v21 = vpop.eup %2202  ;;  %1409 = vadd.xlane.f32.xlu1 %v2823_v16  ;;  %v1266_v39 = vpop.xlane.xlu1 %1265  ;;  %v1359_v24 = vmul.f32 1.442695, %v1315_v37 }
 0x427   :  { %2212 = vpow2.f32 %v1357_v20  ;;  %v1316_v23 = vsub.f32 %v2723_v45, %v1266_v39  ;;  %1407 = vadd.xlane.f32.xlu0 %v2825_v21  ;;  %v1268_v41 = vpop.xlane.xlu0 %1267 }
 0x428   :  { %2214 = vpow2.f32 %v1355_v13  ;;  %v1317_v26 = vsub.f32 %v2726_v48, %v1268_v41 }
 0x429   :  { %v2831_v28 = vpop.eup %2204  ;;  %v1361_v43 = vmul.f32 1.442695, %v1316_v23 }
 0x42a   :  { %v2833_v30 = vpop.eup %2206  ;;  %1413 = vadd.xlane.f32.xlu1 %v2831_v28  ;;  %v1270_v32 = vpop.xlane.xlu1 %1269  ;;  %v1363_v34 = vmul.f32 1.442695, %v1317_v26 }
 0x42b   :  { %2216 = vpow2.f32 %v1361_v43  ;;  %v1318_v11 = vsub.f32 %v2731_v50, %v1270_v32  ;;  %1411 = vadd.xlane.f32.xlu0 %v2833_v30  ;;  %v1272_v45 = vpop.xlane.xlu0 %1271 }
 0x42c   :  { %2218 = vpow2.f32 %v1359_v24  ;;  %v1319_v36 = vsub.f32 %v2734_v52, %v1272_v45 }
 0x42d   :  { %v2839_v38 = vpop.eup %2208  ;;  %v1365_v48 = vmul.f32 1.442695, %v1318_v11 }
 0x42e   :  { %v2841_v40 = vpop.eup %2210  ;;  %1417 = vadd.xlane.f32.xlu1 %v2839_v38  ;;  %v1274_v42 = vpop.xlane.xlu1 %1273  ;;  %v1367_v44 = vmul.f32 1.442695, %v1319_v36 }
 0x42f   :  { %2220 = vpow2.f32 %v1365_v48  ;;  %v1320_v18 = vsub.f32 %v2739_v12, %v1274_v42  ;;  %1415 = vadd.xlane.f32.xlu0 %v2841_v40  ;;  %v1276_v50 = vpop.xlane.xlu0 %1275 }
 0x430   :  { %2222 = vpow2.f32 %v1363_v34  ;;  %v1321_v46 = vsub.f32 %v2742_v55, %v1276_v50 }
 0x431   :  { %v2847_v49 = vpop.eup %2212  ;;  %v1369_v52 = vmul.f32 1.442695, %v1320_v18 }
 0x432   :  { %v2849_v22 = vpop.eup %2214  ;;  %1421 = vadd.xlane.f32.xlu1 %v2847_v49  ;;  %v1278_v51 = vpop.xlane.xlu1 %1277  ;;  %v1371_v25 = vmul.f32 1.442695, %v1321_v46 }
 0x433   :  { %2224 = vpow2.f32 %v1369_v52  ;;  %v1322_v53 = vsub.f32 %v2747_v57, %v1278_v51  ;;  %1419 = vadd.xlane.f32.xlu0 %v2849_v22  ;;  %v1280_v12 = vpop.xlane.xlu0 %1279 }
 0x434   :  { %2226 = vpow2.f32 %v1367_v44  ;;  %v1323_v54 = vsub.f32 %v2750_v59, %v1280_v12 }
 0x435   :  { %v2855_v27 = vpop.eup %2216  ;;  %v1373_v55 = vmul.f32 1.442695, %v1322_v53 }
 0x436   :  { %v2857_v56 = vpop.eup %2218  ;;  %1425 = vadd.xlane.f32.xlu1 %v2855_v27  ;;  %v1282_v29 = vpop.xlane.xlu1 %1281  ;;  %v1375_v19 = vmul.f32 1.442695, %v1323_v54 }
 0x437   :  { %2228 = vpow2.f32 %v1373_v55  ;;  %v1324_v31 = vsub.f32 %v2755_v61, %v1282_v29  ;;  %1423 = vadd.xlane.f32.xlu0 %v2857_v56  ;;  %v1284_v57 = vpop.xlane.xlu0 %1283 }
 0x438   :  { %2230 = vpow2.f32 %v1371_v25  ;;  %v1325_v63 = vsub.f32 %v2758_v62, %v1284_v57 }
 0x439   :  { %v2863_v33 = vpop.eup %2220  ;;  %v1377_v59 = vmul.f32 1.442695, %v1324_v31 }
 0x43a   :  { %v2865_v1 = vpop.eup %2222  ;;  %1429 = vadd.xlane.f32.xlu1 %v2863_v33  ;;  %v1286_v35 = vpop.xlane.xlu1 %1285  ;;  %v1379_v7 = vmul.f32 1.442695, %v1325_v63 }
 0x43b   :  { %2232 = vpow2.f32 %v1377_v59  ;;  %v1326_v5 = vsub.f32 %v2763_v0, %v1286_v35  ;;  %1427 = vadd.xlane.f32.xlu0 %v2865_v1  ;;  %v1288_v61 = vpop.xlane.xlu0 %1287 }
 0x43c   :  { %2234 = vpow2.f32 %v1375_v19  ;;  %v1327_v9 = vsub.f32 %v2766_v2, %v1288_v61 }
 0x43d   :  { %v2871_v13 = vpop.eup %2224  ;;  %v1381_v62 = vmul.f32 1.442695, %v1326_v5 }
 0x43e   :  { %v2873_v37 = vpop.eup %2226  ;;  %1433 = vadd.xlane.f32.xlu1 %v2871_v13  ;;  %v1290_v20 = vpop.xlane.xlu1 %1289  ;;  %v1383_v23 = vmul.f32 1.442695, %v1327_v9 }
 0x43f   :  { %2236 = vpow2.f32 %v1381_v62  ;;  %v1328_v39 = vsub.f32 %v2771_v4, %v1290_v20  ;;  %1431 = vadd.xlane.f32.xlu0 %v2873_v37  ;;  %v1292_v0 = vpop.xlane.xlu0 %1291 }
 0x440   :  { %2238 = vpow2.f32 %v1379_v7  ;;  %v1329_v41 = vsub.f32 %v2774_v6, %v1292_v0 }
 0x441   :  { %v2879_v24 = vpop.eup %2228  ;;  %v1385_v2 = vmul.f32 1.442695, %v1328_v39 }
 0x442   :  { %v2881_v26 = vpop.eup %2230  ;;  %1437 = vadd.xlane.f32.xlu1 %v2879_v24  ;;  %v1294_v43 = vpop.xlane.xlu1 %1293  ;;  %v1387_v11 = vmul.f32 1.442695, %v1329_v41 }
 0x443   :  { %2240 = vpow2.f32 %v1385_v2  ;;  %v1330_v32 = vsub.f32 %v2779_v8, %v1294_v43  ;;  %1435 = vadd.xlane.f32.xlu0 %v2881_v26  ;;  %v1296_v4 = vpop.xlane.xlu0 %1295 }
 0x444   :  { %2242 = vpow2.f32 %v1383_v23  ;;  %v1331_v45 = vsub.f32 %v2782_v10, %v1296_v4 }
 0x445   :  { %v2887_v34 = vpop.eup %2232  ;;  %v1389_v6 = vmul.f32 1.442695, %v1330_v32 }
 0x446   :  { %v2889_v36 = vpop.eup %2234  ;;  %1441 = vadd.xlane.f32.xlu1 %v2887_v34  ;;  %v1298_v48 = vpop.xlane.xlu1 %1297  ;;  %v1391_v18 = vmul.f32 1.442695, %v1331_v45 }
 0x447   :  { %2244 = vpow2.f32 %v1389_v6  ;;  %v1332_v42 = vsub.f32 %v2787_v14, %v1298_v48  ;;  %1439 = vadd.xlane.f32.xlu0 %v2889_v36  ;;  %v1300_v8 = vpop.xlane.xlu0 %1299 }
 0x448   :  { %2246 = vpow2.f32 %v1387_v11  ;;  %v1333_v50 = vsub.f32 %v2793_v17, %v1300_v8 }
 0x449   :  { %v2895_v44 = vpop.eup %2236  ;;  %v1393_v10 = vmul.f32 1.442695, %v1332_v42 }
 0x44a   :  { %v2897_v46 = vpop.eup %2238  ;;  %1445 = vadd.xlane.f32.xlu1 %v2895_v44  ;;  %v1302_v52 = vpop.xlane.xlu1 %1301  ;;  %v1395_v14 = vmul.f32 1.442695, %v1333_v50 }
 0x44b   :  { %2248 = vpow2.f32 %v1393_v10  ;;  %v1334_v51 = vsub.f32 %v2790_v15, %v1302_v52  ;;  %1443 = vadd.xlane.f32.xlu0 %v2897_v46 }
 0x44c   :  { %2250 = vpow2.f32 %v1391_v18 }
 0x44d   :  { %v2902_v53 = vpop.eup %2240  ;;  %v1397_v12 = vmul.f32 1.442695, %v1334_v51 }
 0x44e   :  { %v2904_v25 = vpop.eup %2242  ;;  %1449 = vadd.xlane.f32.xlu1 %v2902_v53 }
 0x44f   :  { %2252 = vpow2.f32 %v1397_v12  ;;  %1447 = vadd.xlane.f32.xlu0 %v2904_v25 }
 0x450   :  { %2254 = vpow2.f32 %v1395_v14 }
 0x451   :  { %v2908_v17 = vpop.eup %2244 }
 0x452   :  { %v2910_v54 = vpop.eup %2246  ;;  %1453 = vadd.xlane.f32.xlu1 %v2908_v17 }
 0x453   :  { %1451 = vadd.xlane.f32.xlu0 %v2910_v54 }
 0x455   :  { %v2914_v15 = vpop.eup %2248 }
 0x456   :  { %v2916_v55 = vpop.eup %2250  ;;  %1457 = vadd.xlane.f32.xlu1 %v2914_v15 }
 0x457   :  { %1455 = vadd.xlane.f32.xlu0 %v2916_v55 }
 0x459   :  { %v2920_v29 = vpop.eup %2252 }
 0x45a   :  { %v2922_v31 = vpop.eup %2254  ;;  %1461 = vadd.xlane.f32.xlu1 %v2920_v29 }
 0x45b   :  { %1459 = vadd.xlane.f32.xlu0 %v2922_v31 }
 0x4a7   :  { %v1402_v57 = vpop.xlane.xlu1 %1401 }
 0x4a8   :  { %2256 = vrcp.f32 %v1402_v57 }
 0x4ab   :  { %v1406_v19 = vpop.xlane.xlu1 %1405 }
 0x4ac   :  { %2258 = vrcp.f32 %v1406_v19  ;;  %v1400_v63 = vpop.xlane.xlu0 %1399 }
 0x4ad   :  { %2260 = vrcp.f32 %v1400_v63 }
 0x4b0   :  { %v1404_v59 = vpop.xlane.xlu0 %1403 }
 0x4b1   :  { %2262 = vrcp.f32 %v1404_v59 }
 0x4b2   :  { %v2257_v35 = vpop.eup %2256 }
 0x4b3   :  { %v1466_v5 = vmul.f32 %v2257_v35, %v2805_v47  ;;  %v1410_v61 = vpop.xlane.xlu1 %1409 }
 0x4b4   :  { %2264 = vrcp.f32 %v1410_v61  ;;  %v1408_v7 = vpop.xlane.xlu0 %1407 }
 0x4b5   :  { %1528 = vst [vmem:[%s3058_s4 + $0x8] sm:$0xff] %v1466_v5  ;;  %2266 = vrcp.f32 %v1408_v7 }
 0x4b6   :  { %v2259_v9 = vpop.eup %2258 }
 0x4b7   :  { %v2261_v62 = vpop.eup %2260  ;;  %v1470_v20 = vmul.f32 %v2259_v9, %v2810_v58  ;;  %v1414_v39 = vpop.xlane.xlu1 %1413 }
 0x4b8   :  { %v1464_v0 = vmul.f32 %v2261_v62, %v2812_v60  ;;  %2268 = vrcp.f32 %v1414_v39  ;;  %v1412_v23 = vpop.xlane.xlu0 %1411 }
 0x4b9   :  { %1530 = vst [vmem:[%s3058_s4 + $0x18] sm:$0xff] %v1470_v20  ;;  %2270 = vrcp.f32 %v1412_v23 }
 0x4ba   :  { %1527 = vst [vmem:[%s3058_s4] sm:$0xff] %v1464_v0 }
 0x4bb   :  { %v2263_v47 = vpop.eup %2262  ;;  %v1418_v41 = vpop.xlane.xlu1 %1417 }
 0x4bc   :  { %v1468_v2 = vmul.f32 %v2263_v47, %v2818_v3  ;;  %2272 = vrcp.f32 %v1418_v41  ;;  %v1416_v58 = vpop.xlane.xlu0 %1415 }
 0x4bd   :  { %2274 = vrcp.f32 %v1416_v58 }
 0x4be   :  { %v2265_v43 = vpop.eup %2264  ;;  %1529 = vst [vmem:[%s3058_s4 + $0x10] sm:$0xff] %v1468_v2 }
 0x4bf   :  { %v2267_v60 = vpop.eup %2266  ;;  %v1474_v32 = vmul.f32 %v2265_v43, %v2823_v16  ;;  %v1422_v4 = vpop.xlane.xlu1 %1421 }
 0x4c0   :  { %v1472_v11 = vmul.f32 %v2267_v60, %v2825_v21  ;;  %2276 = vrcp.f32 %v1422_v4  ;;  %v1420_v45 = vpop.xlane.xlu0 %1419 }
 0x4c1   :  { %1532 = vst [vmem:[%s3058_s4 + $0x28] sm:$0xff] %v1474_v32  ;;  %2278 = vrcp.f32 %v1420_v45 }
 0x4c2   :  { %v2269_v3 = vpop.eup %2268  ;;  %1531 = vst [vmem:[%s3058_s4 + $0x20] sm:$0xff] %v1472_v11 }
 0x4c3   :  { %v2271_v6 = vpop.eup %2270  ;;  %v1478_v48 = vmul.f32 %v2269_v3, %v2831_v28  ;;  %v1426_v42 = vpop.xlane.xlu1 %1425 }
 0x4c4   :  { %v1476_v16 = vmul.f32 %v2271_v6, %v2833_v30  ;;  %2280 = vrcp.f32 %v1426_v42  ;;  %v1424_v21 = vpop.xlane.xlu0 %1423 }
 0x4c5   :  { %1534 = vst [vmem:[%s3058_s4 + $0x38] sm:$0xff] %v1478_v48  ;;  %2282 = vrcp.f32 %v1424_v21 }
 0x4c6   :  { %v2273_v8 = vpop.eup %2272  ;;  %1533 = vst [vmem:[%s3058_s4 + $0x30] sm:$0xff] %v1476_v16 }
 0x4c7   :  { %v2275_v18 = vpop.eup %2274  ;;  %v1482_v50 = vmul.f32 %v2273_v8, %v2839_v38  ;;  %v1430_v10 = vpop.xlane.xlu1 %1429 }
 0x4c8   :  { %v1480_v28 = vmul.f32 %v2275_v18, %v2841_v40  ;;  %2284 = vrcp.f32 %v1430_v10  ;;  %v1428_v30 = vpop.xlane.xlu0 %1427 }
 0x4c9   :  { %1536 = vst [vmem:[%s3058_s4 + $0x48] sm:$0xff] %v1482_v50  ;;  %2286 = vrcp.f32 %v1428_v30 }
 0x4ca   :  { %v2277_v52 = vpop.eup %2276  ;;  %1535 = vst [vmem:[%s3058_s4 + $0x40] sm:$0xff] %v1480_v28 }
 0x4cb   :  { %v2279_v51 = vpop.eup %2278  ;;  %v1486_v14 = vmul.f32 %v2277_v52, %v2847_v49  ;;  %v1434_v12 = vpop.xlane.xlu1 %1433 }
 0x4cc   :  { %v1484_v38 = vmul.f32 %v2279_v51, %v2849_v22  ;;  %2288 = vrcp.f32 %v1434_v12  ;;  %v1432_v40 = vpop.xlane.xlu0 %1431 }
 0x4cd   :  { %1538 = vst [vmem:[%s3058_s4 + $0x58] sm:$0xff] %v1486_v14  ;;  %2290 = vrcp.f32 %v1432_v40 }
 0x4ce   :  { %v2281_v57 = vpop.eup %2280  ;;  %1537 = vst [vmem:[%s3058_s4 + $0x50] sm:$0xff] %v1484_v38 }
 0x4cf   :  { %v2283_v19 = vpop.eup %2282  ;;  %v1490_v63 = vmul.f32 %v2281_v57, %v2855_v27  ;;  %v1438_v59 = vpop.xlane.xlu1 %1437 }
 0x4d0   :  { %v1488_v49 = vmul.f32 %v2283_v19, %v2857_v56  ;;  %2292 = vrcp.f32 %v1438_v59  ;;  %v1436_v22 = vpop.xlane.xlu0 %1435 }
 0x4d1   :  { %1540 = vst [vmem:[%s3058_s4 + $0x68] sm:$0xff] %v1490_v63  ;;  %2294 = vrcp.f32 %v1436_v22 }
 0x4d2   :  { %v2285_v35 = vpop.eup %2284  ;;  %1539 = vst [vmem:[%s3058_s4 + $0x60] sm:$0xff] %v1488_v49 }
 0x4d3   :  { %v2287_v5 = vpop.eup %2286  ;;  %v1494_v61 = vmul.f32 %v2285_v35, %v2863_v33  ;;  %v1442_v7 = vpop.xlane.xlu1 %1441 }
 0x4d4   :  { %v1492_v27 = vmul.f32 %v2287_v5, %v2865_v1  ;;  %2296 = vrcp.f32 %v1442_v7  ;;  %v1440_v56 = vpop.xlane.xlu0 %1439 }
 0x4d5   :  { %1542 = vst [vmem:[%s3058_s4 + $0x78] sm:$0xff] %v1494_v61  ;;  %2298 = vrcp.f32 %v1440_v56 }
 0x4d6   :  { %v2289_v9 = vpop.eup %2288  ;;  %1541 = vst [vmem:[%s3058_s4 + $0x70] sm:$0xff] %v1492_v27 }
 0x4d7   :  { %v2291_v62 = vpop.eup %2290  ;;  %v1498_v20 = vmul.f32 %v2289_v9, %v2871_v13  ;;  %v1446_v39 = vpop.xlane.xlu1 %1445 }
 0x4d8   :  { %v1496_v33 = vmul.f32 %v2291_v62, %v2873_v37  ;;  %2300 = vrcp.f32 %v1446_v39  ;;  %v1444_v1 = vpop.xlane.xlu0 %1443 }
 0x4d9   :  { %1544 = vst [vmem:[%s3058_s4 + $0x88] sm:$0xff] %v1498_v20  ;;  %2302 = vrcp.f32 %v1444_v1 }
 0x4da   :  { %v2293_v0 = vpop.eup %2292  ;;  %1543 = vst [vmem:[%s3058_s4 + $0x80] sm:$0xff] %v1496_v33 }
 0x4db   :  { %v2295_v23 = vpop.eup %2294  ;;  %v1502_v47 = vmul.f32 %v2293_v0, %v2879_v24  ;;  %v1450_v41 = vpop.xlane.xlu1 %1449 }
 0x4dc   :  { %v1500_v13 = vmul.f32 %v2295_v23, %v2881_v26  ;;  %2304 = vrcp.f32 %v1450_v41  ;;  %v1448_v37 = vpop.xlane.xlu0 %1447 }
 0x4dd   :  { %1546 = vst [vmem:[%s3058_s4 + $0x98] sm:$0xff] %v1502_v47  ;;  %2306 = vrcp.f32 %v1448_v37 }
 0x4de   :  { %v2297_v2 = vpop.eup %2296  ;;  %1545 = vst [vmem:[%s3058_s4 + $0x90] sm:$0xff] %v1500_v13 }
 0x4df   :  { %v2299_v58 = vpop.eup %2298  ;;  %v1506_v43 = vmul.f32 %v2297_v2, %v2887_v34  ;;  %v1454_v60 = vpop.xlane.xlu1 %1453 }
 0x4e0   :  { %v1504_v24 = vmul.f32 %v2299_v58, %v2889_v36  ;;  %2308 = vrcp.f32 %v1454_v60  ;;  %v1452_v26 = vpop.xlane.xlu0 %1451 }
 0x4e1   :  { %1548 = vst [vmem:[%s3058_s4 + $0xa8] sm:$0xff] %v1506_v43  ;;  %2310 = vrcp.f32 %v1452_v26 }
 0x4e2   :  { %v2301_v32 = vpop.eup %2300  ;;  %1547 = vst [vmem:[%s3058_s4 + $0xa0] sm:$0xff] %v1504_v24 }
 0x4e3   :  { %v2303_v4 = vpop.eup %2302  ;;  %v1510_v11 = vmul.f32 %v2301_v32, %v2895_v44  ;;  %v1458_v45 = vpop.xlane.xlu1 %1457 }
 0x4e4   :  { %v1508_v34 = vmul.f32 %v2303_v4, %v2897_v46  ;;  %2312 = vrcp.f32 %v1458_v45  ;;  %v1456_v36 = vpop.xlane.xlu0 %1455 }
 0x4e5   :  { %1550 = vst [vmem:[%s3058_s4 + $0xb8] sm:$0xff] %v1510_v11  ;;  %2314 = vrcp.f32 %v1456_v36 }
 0x4e6   :  { %v2305_v3 = vpop.eup %2304  ;;  %1549 = vst [vmem:[%s3058_s4 + $0xb0] sm:$0xff] %v1508_v34 }
 0x4e7   :  { %v2307_v6 = vpop.eup %2306  ;;  %v1514_v48 = vmul.f32 %v2305_v3, %v2902_v53  ;;  %v1462_v42 = vpop.xlane.xlu1 %1461 }
 0x4e8   :  { %v1512_v44 = vmul.f32 %v2307_v6, %v2904_v25  ;;  %2316 = vrcp.f32 %v1462_v42  ;;  %v1460_v46 = vpop.xlane.xlu0 %1459 }
 0x4e9   :  { %1552 = vst [vmem:[%s3058_s4 + $0xc8] sm:$0xff] %v1514_v48  ;;  %2318 = vrcp.f32 %v1460_v46 }
 0x4ea   :  { %v2309_v16 = vpop.eup %2308  ;;  %1551 = vst [vmem:[%s3058_s4 + $0xc0] sm:$0xff] %v1512_v44 }
 0x4eb   :  { %v2311_v21 = vpop.eup %2310  ;;  %v1518_v8 = vmul.f32 %v2309_v16, %v2908_v17 }
 0x4ec   :  { %v1516_v53 = vmul.f32 %v2311_v21, %v2910_v54 }
 0x4ed   :  { %1554 = vst [vmem:[%s3058_s4 + $0xd8] sm:$0xff] %v1518_v8 }
 0x4ee   :  { %v2313_v25 = vpop.eup %2312  ;;  %1553 = vst [vmem:[%s3058_s4 + $0xd0] sm:$0xff] %v1516_v53 }
 0x4ef   :  { %v2315_v18 = vpop.eup %2314  ;;  %v1522_v50 = vmul.f32 %v2313_v25, %v2914_v15 }
 0x4f0   :  { %v1520_v10 = vmul.f32 %v2315_v18, %v2916_v55 }
 0x4f1   :  { %1556 = vst [vmem:[%s3058_s4 + $0xe8] sm:$0xff] %v1522_v50 }
 0x4f2   :  { %v2317_v17 = vpop.eup %2316  ;;  %1555 = vst [vmem:[%s3058_s4 + $0xe0] sm:$0xff] %v1520_v10 }
 0x4f3   :  { %v2319_v54 = vpop.eup %2318  ;;  %v1526_v28 = vmul.f32 %v2317_v17, %v2920_v29 }
 0x4f4   :  { %v1524_v30 = vmul.f32 %v2319_v54, %v2922_v31 }
 0x4f5   :  { %1558 = vst [vmem:[%s3058_s4 + $0xf8] sm:$0xff] %v1526_v28 }
 0x4f6   :  { %1557 = vst [vmem:[%s3058_s4 + $0xf0] sm:$0xff] %v1524_v30 }
 0x4f7   :  { %1563 = vsyncpa [#allocation3], 1 }

</bundles_post_ra>
